<compile_context>
chip_gen: v7x
topology: tpu7x:2x2x1
jax: 0.10.0
libtpu: 0.0.40
codegen_flags: <defaults>
</compile_context>

<pallas_src>
from functools import partial

import jax
import jax.numpy as jnp
from jax.experimental import pallas as pl
from jax.experimental.pallas import tpu as pltpu


def _round_up(x, m):
    return (x + m - 1) // m * m


def _pad2d(x, rows, cols):
    pr, pc = rows - x.shape[0], cols - x.shape[1]
    if pr == 0 and pc == 0:
        return x
    return jnp.pad(x, ((0, pr), (0, pc)))


# Chip detection (for tile caps / megacore-friendly grid splitting only).
try:
    _DEVICE_KIND = jax.devices()[0].device_kind.lower()
except Exception:  # pragma: no cover
    _DEVICE_KIND = ""
_IS_V7 = "v7" in _DEVICE_KIND
_BIG_MXU = ("v6" in _DEVICE_KIND) or _IS_V7      # 256x256 MXUs on v6e/v7x


# -----------------------------------------------------------------------------
# Pallas kernels
# -----------------------------------------------------------------------------
def gemm_bias_kernel(a_ref, w_ref, b_ref, o_ref, acc_ref, *, relu, nk):
    """out = [relu](A @ W + bias).  Single-pass K when nk==1, else K-tiled."""
    if nk == 1:
        y = jnp.dot(a_ref[...], w_ref[...],
                    preferred_element_type=jnp.float32) + b_ref[...]
        if relu:
            y = jnp.maximum(y, 0.0)
        o_ref[...] = y.astype(o_ref.dtype)
    else:
        @pl.when(pl.program_id(2) == 0)
        def _():
            acc_ref[...] = jnp.zeros_like(acc_ref)

        acc_ref[...] += jnp.dot(a_ref[...], w_ref[...],
                                preferred_element_type=jnp.float32)

        @pl.when(pl.program_id(2) == nk - 1)
        def _():
            y = acc_ref[...] + b_ref[...]
            if relu:
                y = jnp.maximum(y, 0.0)
            o_ref[...] = y.astype(o_ref.dtype)


def gcn_group_kernel(adj_ref, x_ref, w_ref, b_ref, g_ref, be_ref, o_ref, *,
                     groups_per_step, S):
    """h = (adj_rows @ x) @ W + b -> per-group LayerNorm([S, Cout]) -> ReLU.

    The 1x1-conv weight multiply is fused here (no separate x@W GEMM / HBM
    round-trip).  Cin is zero-padded to 128 at the wrapper so both matmuls
    are lane dense.  LayerNorm stats are computed in one pass.
    """
    ax = jnp.dot(adj_ref[...], x_ref[...], preferred_element_type=jnp.float32)
    h = jnp.dot(ax.astype(jnp.bfloat16), w_ref[...],
                preferred_element_type=jnp.float32) + b_ref[...]
    gamma = g_ref[...]
    beta = be_ref[...]
    inv_n = 1.0 / (S * h.shape[1])
    for g in range(groups_per_step):          # small static unroll (<= 8)
        blk = h[g * S:(g + 1) * S, :]         # (S, Cout); tile-aligned slice
        mu = jnp.sum(blk) * inv_n
        ex2 = jnp.sum(blk * blk) * inv_n
        var = jnp.maximum(ex2 - mu * mu, 0.0)
        hn = (blk - mu) * jax.lax.rsqrt(var + 1e-5) * gamma + beta
        o_ref[g * S:(g + 1) * S, :] = jnp.maximum(hn, 0.0).astype(o_ref.dtype)


def classifier_kernel(x_ref, w1_ref, b1_ref, w2_ref, b2_ref, o_ref):
    """Fused fc1 + ReLU + fc2 (dropout = identity at inference)."""
    h = jnp.dot(x_ref[...], w1_ref[...],
                preferred_element_type=jnp.float32) + b1_ref[...]
    h = jnp.maximum(h, 0.0).astype(jnp.bfloat16)
    o_ref[...] = jnp.dot(h, w2_ref[...],
                         preferred_element_type=jnp.float32) + b2_ref[...]


# -----------------------------------------------------------------------------
# Pallas wrappers
# -----------------------------------------------------------------------------
def gemm(a, w_p, b_p, n_out, *, relu=False, out_dtype=jnp.float32):
    """Tiled GEMM + bias [+ ReLU].  bf16 operands, f32 accumulation.

    `w_p` / `b_p` are pre-padded, pre-cast weights (prepare_params); only the
    activation `a` is padded here (static shapes, cheap).  Single K pass when
    the K tile fits VMEM comfortably.
    """
    M, K = a.shape
    Kp, Np = w_p.shape

    tm_cap = 256 if _BIG_MXU else 128
    tm = min(tm_cap, _round_up(M, 16))          # 16-sublane bf16 packing
    Mp = _round_up(M, tm)
    if _IS_V7 and Mp // tm < 2 and M >= 32:     # keep >=2 parallel steps on v7x
        tm = _round_up((tm + 1) // 2, 16)
        Mp = _round_up(M, tm)
    tn = 256 if (_BIG_MXU and Np % 256 == 0) else 128
    tk = Kp if Kp <= 2048 else 1024             # one K pass for all shapes here
    Kp2 = _round_up(Kp, tk)
    nk = Kp2 // tk

    a_p = _pad2d(a.astype(jnp.bfloat16), Mp, Kp2)
    w_pp = w_p if Kp2 == Kp else _pad2d(w_p, Kp2, Np)

    vmem_est = (2 * ((tm * tk + tk * tn) * 2 + tn * 4)
                + 2 * tm * tn * jnp.dtype(out_dtype).itemsize
                + tm * tn * 4 + (2 << 20))
    out = pl.pallas_call(
        partial(gemm_bias_kernel, relu=relu, nk=nk),
        out_shape=jax.ShapeDtypeStruct((Mp, Np), out_dtype),
        grid=(Mp // tm, Np // tn, nk),
        in_specs=[
            pl.BlockSpec((tm, tk), lambda i, j, k: (i, k)),
            pl.BlockSpec((tk, tn), lambda i, j, k: (k, j)),
            pl.BlockSpec((1, tn), lambda i, j, k: (0, j)),
        ],
        out_specs=pl.BlockSpec((tm, tn), lambda i, j, k: (i, j)),
        scratch_shapes=[pltpu.VMEM((tm, tn), jnp.float32)],
        compiler_params=pltpu.CompilerParams(
            dimension_semantics=("parallel", "parallel", "arbitrary"),
            vmem_limit_bytes=int(min(48 << 20, max(32 << 20, vmem_est)))),
    )(a_p, w_pp, b_p)
    return out[:M, :n_out]


def _pick_gps(groups, S):
    """Groups of S rows per grid step; on v7x keep >=2 steps for 2 TCs."""
    cap = max(1, 128 // S)
    divisors = [g for g in range(1, min(groups, cap) + 1) if groups % g == 0]
    if _IS_V7 and groups >= 2:
        two_step = [g for g in divisors if groups // g >= 2]
        if two_step:
            return max(two_step)
    # TODO(synk): pad `groups` to a convenient multiple instead of degrading
    # to gps=1 (S-row matmuls) when groups has no divisor <= 128//S.
    return max(divisors)


def gcn_layer(x, adj_bf16, w_p, b_p, gamma, beta, *, patch_size,
              out_dtype=jnp.bfloat16):
    """One MBGCNLayer: (adj@x) -> 1x1 conv -> LayerNorm([S, Cout]) -> ReLU."""
    N = x.shape[0]
    cin_p, cout = w_p.shape
    S = patch_size * patch_size
    groups = N // S

    x_p = x.astype(jnp.bfloat16)
    if x_p.shape[1] < cin_p:                    # lane-dense contraction dim
        x_p = jnp.pad(x_p, ((0, 0), (0, cin_p - x_p.shape[1])))

    gps = _pick_gps(groups, S)
    rows = gps * S

    # TODO(synk): K-tile the adj contraction (over N) with a VMEM f32
    # accumulator once N grows to ~48-64K so the working set stays within
    # v7x's 64 MiB VMEM; at these sizes a single pass is strictly cheaper.
    return pl.pallas_call(
        partial(gcn_group_kernel, groups_per_step=gps, S=S),
        out_shape=jax.ShapeDtypeStruct((N, cout), out_dtype),
        grid=(groups // gps,),
        in_specs=[
            pl.BlockSpec((rows, N), lambda i: (i, 0)),      # adj rows for step
            pl.BlockSpec((N, cin_p), lambda i: (0, 0)),     # node features
            pl.BlockSpec((cin_p, cout), lambda i: (0, 0)),  # conv1x1 weight
            pl.BlockSpec((1, cout), lambda i: (0, 0)),      # conv1x1 bias
            pl.BlockSpec((S, cout), lambda i: (0, 0)),      # LN gamma
            pl.BlockSpec((S, cout), lambda i: (0, 0)),      # LN beta
        ],
        out_specs=pl.BlockSpec((rows, cout), lambda i: (i, 0)),
        compiler_params=pltpu.CompilerParams(
            dimension_semantics=("parallel",)),
    )(adj_bf16, x_p, w_p, b_p, gamma, beta)


def classifier(fused, w1_p, b1_p, w2_p, b2_p, n_classes):
    """Fused Linear(256->128) + ReLU + Linear(128->C) in one pallas_call."""
    B, D = fused.shape
    H = w1_p.shape[1]
    Cp = w2_p.shape[1]
    Bp = _round_up(B, 16)                        # 16-sublane bf16 packing

    x_p = _pad2d(fused.astype(jnp.bfloat16), Bp, D)
    out = pl.pallas_call(
        classifier_kernel,
        out_shape=jax.ShapeDtypeStruct((Bp, Cp), jnp.float32),
        grid=(1,),
        in_specs=[
            pl.BlockSpec((Bp, D), lambda i: (0, 0)),
            pl.BlockSpec((D, H), lambda i: (0, 0)),
            pl.BlockSpec((1, H), lambda i: (0, 0)),
            pl.BlockSpec((H, Cp), lambda i: (0, 0)),
            pl.BlockSpec((1, Cp), lambda i: (0, 0)),
        ],
        out_specs=pl.BlockSpec((Bp, Cp), lambda i: (0, 0)),
        compiler_params=pltpu.CompilerParams(
            dimension_semantics=("arbitrary",)),
    )(x_p, w1_p, b1_p, w2_p, b2_p)
    return out[:B, :n_classes]


# -----------------------------------------------------------------------------
# One-time parameter preparation (outside the jitted forward)
# -----------------------------------------------------------------------------
def _prep_conv(w_t, b, bn_g, bn_b, bn_m, bn_v, bn_eps):
    """Fold eval-mode BN, reorder to (kh*kw*Cin, Cout), pad, cast bf16."""
    cout, cin, kh, kw = w_t.shape
    scale = bn_g / jnp.sqrt(bn_v + bn_eps)                       # (cout,)
    w2 = jnp.transpose(w_t, (2, 3, 1, 0)).reshape(kh * kw * cin, cout) * scale
    bias = (b - bn_m) * scale + bn_b
    Kp, Np = _round_up(kh * kw * cin, 128), _round_up(cout, 128)
    return (_pad2d(w2, Kp, Np).astype(jnp.bfloat16),
            _pad2d(bias.reshape(1, -1).astype(jnp.float32), 1, Np))


def _prep_gcn(w, b):
    cin, cout = w.shape
    w_p = _pad2d(w, _round_up(cin, 128), cout).astype(jnp.bfloat16)
    return w_p, b.reshape(1, -1).astype(jnp.float32)


def _prep_fc(w, b):
    K, N = w.shape
    Kp, Np = _round_up(K, 128), _round_up(N, 128)
    return (_pad2d(w, Kp, Np).astype(jnp.bfloat16),
            _pad2d(b.reshape(1, -1).astype(jnp.float32), 1, Np))


def prepare_params(raw, bn_eps=1e-5):
    p = {}
    for i in (1, 2, 3):
        p[f'conv{i}_w'], p[f'conv{i}_b'] = _prep_conv(
            raw[f'conv{i}_w'], raw[f'conv{i}_b'],
            raw[f'bn{i}_g'], raw[f'bn{i}_b'], raw[f'bn{i}_m'], raw[f'bn{i}_v'],
            bn_eps)
    for i in (1, 2):
        p[f'gcn{i}_w'], p[f'gcn{i}_b'] = _prep_gcn(raw[f'gcn{i}_w'],
                                                   raw[f'gcn{i}_b'])
        p[f'gcn{i}_g'] = raw[f'gcn{i}_g'].astype(jnp.float32)
        p[f'gcn{i}_be'] = raw[f'gcn{i}_be'].astype(jnp.float32)
    p['fc1_w'], p['fc1_b'] = _prep_fc(raw['fc1_w'], raw['fc1_b'])
    p['fc2_w'], p['fc2_b'] = _prep_fc(raw['fc2_w'], raw['fc2_b'])
    return p


# -----------------------------------------------------------------------------
# CNN branch helpers (glue: im2col / pooling; GEMM hot path runs in Pallas)
# -----------------------------------------------------------------------------
def im2col(x, kh, kw, stride, pad):
    # x: NHWC
    # TODO(synk): for realistic image sizes replace this HBM-materialized
    # im2col with an in-kernel DMA gather (scalar-prefetch patch offsets) to
    # avoid the kh*kw x activation traffic blow-up.
    x = jnp.pad(x, ((0, 0), (pad, pad), (pad, pad), (0, 0)))
    B, H, W, C = x.shape
    oh = (H - kh) // stride + 1
    ow = (W - kw) // stride + 1
    cols = []
    for i in range(kh):
        for j in range(kw):
            cols.append(x[:, i:i + (oh - 1) * stride + 1:stride,
                             j:j + (ow - 1) * stride + 1:stride, :])
    cols = jnp.stack(cols, axis=3)  # (B, oh, ow, kh*kw, C)
    return cols.reshape(B * oh * ow, kh * kw * C), oh, ow


def conv_bn_relu(x, w_p, b_p, cout, kh, kw, stride, pad):
    cols, oh, ow = im2col(x, kh, kw, stride, pad)
    y = gemm(cols, w_p, b_p, cout, relu=True, out_dtype=jnp.bfloat16)
    return y.reshape(x.shape[0], oh, ow, cout)


def maxpool2x2(x):
    B, H, W, C = x.shape
    return x.reshape(B, H // 2, 2, W // 2, 2, C).max(axis=(2, 4))


# -----------------------------------------------------------------------------
# Full model forward
# -----------------------------------------------------------------------------
def mbgcnet_forward(params, cnn_input_nchw, gcn_feats, gcn_adj, *,
                    num_patches, patch_size, num_classes):
    S = patch_size * patch_size

    # ---- CNN branch (NHWC internally, bf16 activations) ----
    x = jnp.transpose(cnn_input_nchw, (0, 2, 3, 1)).astype(jnp.bfloat16)
    x = conv_bn_relu(x, params['conv1_w'], params['conv1_b'], 32, 5, 5, 2, 2)
    x = maxpool2x2(x)
    x = conv_bn_relu(x, params['conv2_w'], params['conv2_b'], 64, 7, 7, 2, 3)
    x = maxpool2x2(x)
    x = conv_bn_relu(x, params['conv3_w'], params['conv3_b'], 128, 5, 5, 2, 2)
    cnn_out = jnp.mean(x.astype(jnp.float32), axis=(1, 2))  # (B, 128)
    # TODO(synk): fold the avg-pool / center-node / concat epilogues into the
    # producing kernels' last grid step to drop these tiny XLA dispatches.

    # ---- GCN branch ----
    adj_bf16 = gcn_adj.astype(jnp.bfloat16)  # cast once, reused by both layers
    h = gcn_layer(gcn_feats, adj_bf16, params['gcn1_w'], params['gcn1_b'],
                  params['gcn1_g'], params['gcn1_be'], patch_size=patch_size)
    h = gcn_layer(h, adj_bf16, params['gcn2_w'], params['gcn2_b'],
                  params['gcn2_g'], params['gcn2_be'], patch_size=patch_size)
    h = h.reshape(-1, num_patches, S, 128)
    gcn_out = jnp.mean(h[:, :, S // 2, :].astype(jnp.float32), axis=1)

    # ---- Fusion + classifier (fused fc1+ReLU+fc2; dropout = identity) ----
    fused = jnp.concatenate([cnn_out, gcn_out], axis=1)  # (B, 256)
    return classifier(fused, params['fc1_w'], params['fc1_b'],
                      params['fc2_w'], params['fc2_b'], num_classes)


# -----------------------------------------------------------------------------
# Main
# -----------------------------------------------------------------------------
if __name__ == "__main__":
    B, Cin, H, W = 2, 4, 16, 16
    num_classes = 3
    num_patches = 2
    patch_size = 4
    S = patch_size * patch_size
    N = B * num_patches * S  # total graph nodes

    key = jax.random.PRNGKey(0)
    keys = jax.random.split(key, 20)

    def kaiming(k, shape, fan):
        return (jnp.sqrt(2.0 / fan) * jax.random.normal(k, shape)).astype(jnp.float32)

    raw_params = {
        # CNN branch (torch Conv2d weight layout (Cout, Cin, kh, kw))
        'conv1_w': kaiming(keys[0], (32, Cin, 5, 5), 32 * 25),
        'conv1_b': 0.01 * jax.random.normal(keys[1], (32,), jnp.float32),
        'conv2_w': kaiming(keys[2], (64, 32, 7, 7), 64 * 49),
        'conv2_b': 0.01 * jax.random.normal(keys[3], (64,), jnp.float32),
        'conv3_w': kaiming(keys[4], (128, 64, 5, 5), 128 * 25),
        'conv3_b': 0.01 * jax.random.normal(keys[5], (128,), jnp.float32),
        # Eval-mode BatchNorm parameters / running stats (fresh-module defaults)
        'bn1_g': jnp.ones((32,), jnp.float32), 'bn1_b': jnp.zeros((32,), jnp.float32),
        'bn1_m': jnp.zeros((32,), jnp.float32), 'bn1_v': jnp.ones((32,), jnp.float32),
        'bn2_g': jnp.ones((64,), jnp.float32), 'bn2_b': jnp.zeros((64,), jnp.float32),
        'bn2_m': jnp.zeros((64,), jnp.float32), 'bn2_v': jnp.ones((64,), jnp.float32),
        'bn3_g': jnp.ones((128,), jnp.float32), 'bn3_b': jnp.zeros((128,), jnp.float32),
        'bn3_m': jnp.zeros((128,), jnp.float32), 'bn3_v': jnp.ones((128,), jnp.float32),
        # GCN layer 1 (conv1x1 weight stored as (Cin, Cout))
        'gcn1_w': kaiming(keys[6], (Cin, 128), Cin),
        'gcn1_b': 0.01 * jax.random.normal(keys[7], (128,), jnp.float32),
        'gcn1_g': jnp.ones((S, 128), jnp.float32),
        'gcn1_be': jnp.zeros((S, 128), jnp.float32),
        # GCN layer 2
        'gcn2_w': kaiming(keys[8], (128, 128), 128),
        'gcn2_b': 0.01 * jax.random.normal(keys[9], (128,), jnp.float32),
        'gcn2_g': jnp.ones((S, 128), jnp.float32),
        'gcn2_be': jnp.zeros((S, 128), jnp.float32),
        # Classifier (stored as (in, out) for the GEMM kernels)
        'fc1_w': kaiming(keys[10], (256, 128), 256),
        'fc1_b': 0.01 * jax.random.normal(keys[11], (128,), jnp.float32),
        'fc2_w': kaiming(keys[12], (128, num_classes), 128),
        'fc2_b': 0.01 * jax.random.normal(keys[13], (num_classes,), jnp.float32),
    }

    # One-time fold / reorder / pad / bf16-cast of all static weights,
    # done OUTSIDE the jitted forward so no per-call pad/cast ops are traced.
    params = prepare_params(raw_params)
    params = jax.tree_util.tree_map(jnp.asarray, params)

    cnn_input = jax.random.normal(keys[14], (B, Cin, H, W), jnp.float32)
    gcn_feats = jax.random.normal(keys[15], (N, Cin), jnp.float32)
    gcn_adj = jax.random.normal(keys[16], (N, N), jnp.float32)

    fwd = jax.jit(partial(mbgcnet_forward, num_patches=num_patches,
                          patch_size=patch_size, num_classes=num_classes))
    out = fwd(params, cnn_input, gcn_feats, gcn_adj)
    jax.block_until_ready(out)
    assert out.shape == (B, num_classes), out.shape
    assert jnp.all(jnp.isfinite(out))
    print("KERNEL_OK")
</pallas_src>

<mosaic_0001>
module attributes {stable_mosaic.version = 11 : i64} {
  func.func @gemm_bias_kernel(%arg0: i32, %arg1: i32, %arg2: i32, %arg3: memref<128x128xbf16, #tpu.memory_space<vmem>>, %arg4: memref<128x128xbf16, #tpu.memory_space<vmem>>, %arg5: memref<1x128xf32, #tpu.memory_space<vmem>>, %arg6: memref<128x128xbf16, #tpu.memory_space<vmem>>, %arg7: memref<128x128xf32, #tpu.memory_space<vmem>>) attributes {dimension_semantics = [#tpu.dimension_semantics<parallel>, #tpu.dimension_semantics<parallel>, #tpu.dimension_semantics<arbitrary>], iteration_bounds = array<i64: 1, 1, 1>, scalar_prefetch = 0 : i64, scratch_operands = 1 : i64, tpu.core_type = #tpu.core_type<tc>, window_params = [{transform_indices = @transform_0, window_bounds = array<i64: 128, 128>}, {transform_indices = @transform_1, window_bounds = array<i64: 128, 128>}, {transform_indices = @transform_2, window_bounds = array<i64: 1, 128>}, {transform_indices = @transform_3, window_bounds = array<i64: 128, 128>}]} {
    %c0 = arith.constant 0 : index
    %c0_0 = arith.constant 0 : index
    %0 = vector.load %arg3[%c0, %c0_0] : memref<128x128xbf16, #tpu.memory_space<vmem>>, vector<128x128xbf16>
    %c0_1 = arith.constant 0 : index
    %c0_2 = arith.constant 0 : index
    %1 = vector.load %arg4[%c0_1, %c0_2] : memref<128x128xbf16, #tpu.memory_space<vmem>>, vector<128x128xbf16>
    %cst = arith.constant dense<0.000000e+00> : vector<128x128xf32>
    %2 = tpu.matmul %0, %1, %cst {dimension_numbers = #tpu.dot_dimension_numbers<[1], [0], [0], [1], [0, 0, 1, 1], [], []>} : vector<128x128xbf16>, vector<128x128xbf16>, vector<128x128xf32> -> vector<128x128xf32>
    %c0_3 = arith.constant 0 : index
    %c0_4 = arith.constant 0 : index
    %3 = vector.load %arg5[%c0_3, %c0_4] : memref<1x128xf32, #tpu.memory_space<vmem>>, vector<1x128xf32>
    %4 = vector.broadcast %3 : vector<1x128xf32> to vector<128x128xf32>
    %5 = arith.addf %2, %4 : vector<128x128xf32>
    %cst_5 = arith.constant 0.000000e+00 : f32
    %6 = vector.broadcast %cst_5 : f32 to vector<128x128xf32>
    %7 = arith.maximumf %5, %6 : vector<128x128xf32>
    %8 = arith.truncf %7 : vector<128x128xf32> to vector<128x128xbf16>
    %c0_6 = arith.constant 0 : index
    %c0_7 = arith.constant 0 : index
    %9 = vector.load %arg6[%c0_6, %c0_7] : memref<128x128xbf16, #tpu.memory_space<vmem>>, vector<128x128xbf16>
    tpu.vector_store %arg6[%c0_6, %c0_7], %8 {strides = array<i32>} : memref<128x128xbf16, #tpu.memory_space<vmem>>, vector<128x128xbf16>,
    return
  }
  func.func @transform_0(%arg0: i32, %arg1: i32, %arg2: i32) -> (i32, i32) {
    %c0_i32 = arith.constant 0 : i32
    return %arg0, %arg2 : i32, i32
  }
  func.func @transform_1(%arg0: i32, %arg1: i32, %arg2: i32) -> (i32, i32) {
    %c0_i32 = arith.constant 0 : i32
    return %arg2, %arg1 : i32, i32
  }
  func.func @transform_2(%arg0: i32, %arg1: i32, %arg2: i32) -> (i32, i32) {
    %c0_i32 = arith.constant 0 : i32
    %c0_i32_0 = arith.constant 0 : i32
    return %c0_i32, %arg1 : i32, i32
  }
  func.func @transform_3(%arg0: i32, %arg1: i32, %arg2: i32) -> (i32, i32) {
    %c0_i32 = arith.constant 0 : i32
    return %arg0, %arg1 : i32, i32
  }
}

module attributes {stable_mosaic.version = 11 : i64} {
  func.func @gemm_bias_kernel(%arg0: i32, %arg1: i32, %arg2: i32, %arg3: memref<16x1664xbf16, #tpu.memory_space<vmem>>, %arg4: memref<1664x128xbf16, #tpu.memory_space<vmem>>, %arg5: memref<1x128xf32, #tpu.memory_space<vmem>>, %arg6: memref<16x128xbf16, #tpu.memory_space<vmem>>, %arg7: memref<16x128xf32, #tpu.memory_space<vmem>>) attributes {dimension_semantics = [#tpu.dimension_semantics<parallel>, #tpu.dimension_semantics<parallel>, #tpu.dimension_semantics<arbitrary>], iteration_bounds = array<i64: 1, 1, 1>, scalar_prefetch = 0 : i64, scratch_operands = 1 : i64, tpu.core_type = #tpu.core_type<tc>, window_params = [{transform_indices = @transform_0, window_bounds = array<i64: 16, 1664>}, {transform_indices = @transform_1, window_bounds = array<i64: 1664, 128>}, {transform_indices = @transform_2, window_bounds = array<i64: 1, 128>}, {transform_indices = @transform_3, window_bounds = array<i64: 16, 128>}]} {
    %c0 = arith.constant 0 : index
    %c0_0 = arith.constant 0 : index
    %0 = vector.load %arg3[%c0, %c0_0] : memref<16x1664xbf16, #tpu.memory_space<vmem>>, vector<16x1664xbf16>
    %c0_1 = arith.constant 0 : index
    %c0_2 = arith.constant 0 : index
    %1 = vector.load %arg4[%c0_1, %c0_2] : memref<1664x128xbf16, #tpu.memory_space<vmem>>, vector<1664x128xbf16>
    %cst = arith.constant dense<0.000000e+00> : vector<16x128xf32>
    %2 = tpu.matmul %0, %1, %cst {dimension_numbers = #tpu.dot_dimension_numbers<[1], [0], [0], [1], [0, 0, 1, 1], [], []>} : vector<16x1664xbf16>, vector<1664x128xbf16>, vector<16x128xf32> -> vector<16x128xf32>
    %c0_3 = arith.constant 0 : index
    %c0_4 = arith.constant 0 : index
    %3 = vector.load %arg5[%c0_3, %c0_4] : memref<1x128xf32, #tpu.memory_space<vmem>>, vector<1x128xf32>
    %4 = vector.broadcast %3 : vector<1x128xf32> to vector<16x128xf32>
    %5 = arith.addf %2, %4 : vector<16x128xf32>
    %cst_5 = arith.constant 0.000000e+00 : f32
    %6 = vector.broadcast %cst_5 : f32 to vector<16x128xf32>
    %7 = arith.maximumf %5, %6 : vector<16x128xf32>
    %8 = arith.truncf %7 : vector<16x128xf32> to vector<16x128xbf16>
    %c0_6 = arith.constant 0 : index
    %c0_7 = arith.constant 0 : index
    %9 = vector.load %arg6[%c0_6, %c0_7] : memref<16x128xbf16, #tpu.memory_space<vmem>>, vector<16x128xbf16>
    tpu.vector_store %arg6[%c0_6, %c0_7], %8 {strides = array<i32>} : memref<16x128xbf16, #tpu.memory_space<vmem>>, vector<16x128xbf16>,
    return
  }
  func.func @transform_0(%arg0: i32, %arg1: i32, %arg2: i32) -> (i32, i32) {
    %c0_i32 = arith.constant 0 : i32
    return %arg0, %arg2 : i32, i32
  }
  func.func @transform_1(%arg0: i32, %arg1: i32, %arg2: i32) -> (i32, i32) {
    %c0_i32 = arith.constant 0 : i32
    return %arg2, %arg1 : i32, i32
  }
  func.func @transform_2(%arg0: i32, %arg1: i32, %arg2: i32) -> (i32, i32) {
    %c0_i32 = arith.constant 0 : i32
    %c0_i32_0 = arith.constant 0 : i32
    return %c0_i32, %arg1 : i32, i32
  }
  func.func @transform_3(%arg0: i32, %arg1: i32, %arg2: i32) -> (i32, i32) {
    %c0_i32 = arith.constant 0 : i32
    return %arg0, %arg1 : i32, i32
  }
}

module attributes {stable_mosaic.version = 11 : i64} {
  func.func @classifier_kernel(%arg0: i32, %arg1: memref<16x256xbf16, #tpu.memory_space<vmem>>, %arg2: memref<256x128xbf16, #tpu.memory_space<vmem>>, %arg3: memref<1x128xf32, #tpu.memory_space<vmem>>, %arg4: memref<128x128xbf16, #tpu.memory_space<vmem>>, %arg5: memref<1x128xf32, #tpu.memory_space<vmem>>, %arg6: memref<16x128xf32, #tpu.memory_space<vmem>>) attributes {dimension_semantics = [#tpu.dimension_semantics<arbitrary>], iteration_bounds = array<i64: 1>, scalar_prefetch = 0 : i64, scratch_operands = 0 : i64, tpu.core_type = #tpu.core_type<tc>, window_params = [{pipeline_mode = #tpu.pipeline_mode<synchronous>, transform_indices = @transform_0, window_bounds = array<i64: 16, 256>}, {pipeline_mode = #tpu.pipeline_mode<synchronous>, transform_indices = @transform_1, window_bounds = array<i64: 256, 128>}, {pipeline_mode = #tpu.pipeline_mode<synchronous>, transform_indices = @transform_2, window_bounds = array<i64: 1, 128>}, {pipeline_mode = #tpu.pipeline_mode<synchronous>, transform_indices = @transform_3, window_bounds = array<i64: 128, 128>}, {pipeline_mode = #tpu.pipeline_mode<synchronous>, transform_indices = @transform_4, window_bounds = array<i64: 1, 128>}, {pipeline_mode = #tpu.pipeline_mode<synchronous>, transform_indices = @transform_5, window_bounds = array<i64: 16, 128>}]} {
    %c0 = arith.constant 0 : index
    %c0_0 = arith.constant 0 : index
    %0 = vector.load %arg1[%c0, %c0_0] : memref<16x256xbf16, #tpu.memory_space<vmem>>, vector<16x256xbf16>
    %c0_1 = arith.constant 0 : index
    %c0_2 = arith.constant 0 : index
    %1 = vector.load %arg2[%c0_1, %c0_2] : memref<256x128xbf16, #tpu.memory_space<vmem>>, vector<256x128xbf16>
    %cst = arith.constant dense<0.000000e+00> : vector<16x128xf32>
    %2 = tpu.matmul %0, %1, %cst {dimension_numbers = #tpu.dot_dimension_numbers<[1], [0], [0], [1], [0, 0, 1, 1], [], []>} : vector<16x256xbf16>, vector<256x128xbf16>, vector<16x128xf32> -> vector<16x128xf32>
    %c0_3 = arith.constant 0 : index
    %c0_4 = arith.constant 0 : index
    %3 = vector.load %arg3[%c0_3, %c0_4] : memref<1x128xf32, #tpu.memory_space<vmem>>, vector<1x128xf32>
    %4 = vector.broadcast %3 : vector<1x128xf32> to vector<16x128xf32>
    %5 = arith.addf %2, %4 : vector<16x128xf32>
    %cst_5 = arith.constant 0.000000e+00 : f32
    %6 = vector.broadcast %cst_5 : f32 to vector<16x128xf32>
    %7 = arith.maximumf %5, %6 : vector<16x128xf32>
    %8 = arith.truncf %7 : vector<16x128xf32> to vector<16x128xbf16>
    %c0_6 = arith.constant 0 : index
    %c0_7 = arith.constant 0 : index
    %9 = vector.load %arg4[%c0_6, %c0_7] : memref<128x128xbf16, #tpu.memory_space<vmem>>, vector<128x128xbf16>
    %cst_8 = arith.constant dense<0.000000e+00> : vector<16x128xf32>
    %10 = tpu.matmul %8, %9, %cst_8 {dimension_numbers = #tpu.dot_dimension_numbers<[1], [0], [0], [1], [0, 0, 1, 1], [], []>} : vector<16x128xbf16>, vector<128x128xbf16>, vector<16x128xf32> -> vector<16x128xf32>
    %c0_9 = arith.constant 0 : index
    %c0_10 = arith.constant 0 : index
    %11 = vector.load %arg5[%c0_9, %c0_10] : memref<1x128xf32, #tpu.memory_space<vmem>>, vector<1x128xf32>
    %12 = vector.broadcast %11 : vector<1x128xf32> to vector<16x128xf32>
    %13 = arith.addf %10, %12 : vector<16x128xf32>
    %c0_11 = arith.constant 0 : index
    %c0_12 = arith.constant 0 : index
    %14 = vector.load %arg6[%c0_11, %c0_12] : memref<16x128xf32, #tpu.memory_space<vmem>>, vector<16x128xf32>
    tpu.vector_store %arg6[%c0_11, %c0_12], %13 {strides = array<i32>} : memref<16x128xf32, #tpu.memory_space<vmem>>, vector<16x128xf32>,
    return
  }
  func.func @transform_0(%arg0: i32) -> (i32, i32) {
    %c0_i32 = arith.constant 0 : i32
    %c0_i32_0 = arith.constant 0 : i32
    %c0_i32_1 = arith.constant 0 : i32
    return %c0_i32, %c0_i32_0 : i32, i32
  }
  func.func @transform_1(%arg0: i32) -> (i32, i32) {
    %c0_i32 = arith.constant 0 : i32
    %c0_i32_0 = arith.constant 0 : i32
    %c0_i32_1 = arith.constant 0 : i32
    return %c0_i32, %c0_i32_0 : i32, i32
  }
  func.func @transform_2(%arg0: i32) -> (i32, i32) {
    %c0_i32 = arith.constant 0 : i32
    %c0_i32_0 = arith.constant 0 : i32
    %c0_i32_1 = arith.constant 0 : i32
    return %c0_i32, %c0_i32_0 : i32, i32
  }
  func.func @transform_3(%arg0: i32) -> (i32, i32) {
    %c0_i32 = arith.constant 0 : i32
    %c0_i32_0 = arith.constant 0 : i32
    %c0_i32_1 = arith.constant 0 : i32
    return %c0_i32, %c0_i32_0 : i32, i32
  }
  func.func @transform_4(%arg0: i32) -> (i32, i32) {
    %c0_i32 = arith.constant 0 : i32
    %c0_i32_0 = arith.constant 0 : i32
    %c0_i32_1 = arith.constant 0 : i32
    return %c0_i32, %c0_i32_0 : i32, i32
  }
  func.func @transform_5(%arg0: i32) -> (i32, i32) {
    %c0_i32 = arith.constant 0 : i32
    %c0_i32_0 = arith.constant 0 : i32
    %c0_i32_1 = arith.constant 0 : i32
    return %c0_i32, %c0_i32_0 : i32, i32
  }
}

module attributes {stable_mosaic.version = 11 : i64} {
  func.func @gcn_group_kernel(%arg0: i32, %arg1: memref<64x64xbf16, #tpu.memory_space<vmem>>, %arg2: memref<64x128xbf16, #tpu.memory_space<vmem>>, %arg3: memref<128x128xbf16, #tpu.memory_space<vmem>>, %arg4: memref<1x128xf32, #tpu.memory_space<vmem>>, %arg5: memref<16x128xf32, #tpu.memory_space<vmem>>, %arg6: memref<16x128xf32, #tpu.memory_space<vmem>>, %arg7: memref<64x128xbf16, #tpu.memory_space<vmem>>) attributes {dimension_semantics = [#tpu.dimension_semantics<parallel>], iteration_bounds = array<i64: 1>, scalar_prefetch = 0 : i64, scratch_operands = 0 : i64, tpu.core_type = #tpu.core_type<tc>, window_params = [{transform_indices = @transform_0, window_bounds = array<i64: 64, 64>}, {pipeline_mode = #tpu.pipeline_mode<synchronous>, transform_indices = @transform_1, window_bounds = array<i64: 64, 128>}, {pipeline_mode = #tpu.pipeline_mode<synchronous>, transform_indices = @transform_2, window_bounds = array<i64: 128, 128>}, {pipeline_mode = #tpu.pipeline_mode<synchronous>, transform_indices = @transform_3, window_bounds = array<i64: 1, 128>}, {pipeline_mode = #tpu.pipeline_mode<synchronous>, transform_indices = @transform_4, window_bounds = array<i64: 16, 128>}, {pipeline_mode = #tpu.pipeline_mode<synchronous>, transform_indices = @transform_5, window_bounds = array<i64: 16, 128>}, {transform_indices = @transform_6, window_bounds = array<i64: 64, 128>}]} {
    %c0 = arith.constant 0 : index
    %c0_0 = arith.constant 0 : index
    %0 = vector.load %arg1[%c0, %c0_0] : memref<64x64xbf16, #tpu.memory_space<vmem>>, vector<64x64xbf16>
    %c0_1 = arith.constant 0 : index
    %c0_2 = arith.constant 0 : index
    %1 = vector.load %arg2[%c0_1, %c0_2] : memref<64x128xbf16, #tpu.memory_space<vmem>>, vector<64x128xbf16>
    %cst = arith.constant dense<0.000000e+00> : vector<64x128xf32>
    %2 = tpu.matmul %0, %1, %cst {dimension_numbers = #tpu.dot_dimension_numbers<[1], [0], [0], [1], [0, 0, 1, 1], [], []>} : vector<64x64xbf16>, vector<64x128xbf16>, vector<64x128xf32> -> vector<64x128xf32>
    %3 = arith.truncf %2 : vector<64x128xf32> to vector<64x128xbf16>
    %c0_3 = arith.constant 0 : index
    %c0_4 = arith.constant 0 : index
    %4 = vector.load %arg3[%c0_3, %c0_4] : memref<128x128xbf16, #tpu.memory_space<vmem>>, vector<128x128xbf16>
    %cst_5 = arith.constant dense<0.000000e+00> : vector<64x128xf32>
    %5 = tpu.matmul %3, %4, %cst_5 {dimension_numbers = #tpu.dot_dimension_numbers<[1], [0], [0], [1], [0, 0, 1, 1], [], []>} : vector<64x128xbf16>, vector<128x128xbf16>, vector<64x128xf32> -> vector<64x128xf32>
    %c0_6 = arith.constant 0 : index
    %c0_7 = arith.constant 0 : index
    %6 = vector.load %arg4[%c0_6, %c0_7] : memref<1x128xf32, #tpu.memory_space<vmem>>, vector<1x128xf32>
    %7 = vector.broadcast %6 : vector<1x128xf32> to vector<64x128xf32>
    %8 = arith.addf %5, %7 : vector<64x128xf32>
    %c0_8 = arith.constant 0 : index
    %c0_9 = arith.constant 0 : index
    %9 = vector.load %arg5[%c0_8, %c0_9] : memref<16x128xf32, #tpu.memory_space<vmem>>, vector<16x128xf32>
    %c0_10 = arith.constant 0 : index
    %c0_11 = arith.constant 0 : index
    %10 = vector.load %arg6[%c0_10, %c0_11] : memref<16x128xf32, #tpu.memory_space<vmem>>, vector<16x128xf32>
    %11 = vector.extract_strided_slice %8 {offsets = [0, 0], sizes = [16, 128], strides = [1, 1]} : vector<64x128xf32> to vector<16x128xf32>
    %12 = vector.shape_cast %11 : vector<16x128xf32> to vector<1x16x128xf32>
    %cst_12 = arith.constant dense<0.000000e+00> : vector<1xf32>
    %13 = vector.multi_reduction <add>, %12, %cst_12 [1, 2] : vector<1x16x128xf32> to vector<1xf32>
    %14 = vector.shape_cast %13 : vector<1xf32> to vector<1x1x1xf32>
    %15 = vector.extract %14[0, 0, 0] : f32 from vector<1x1x1xf32>
    %cst_13 = arith.constant 4.8828125E-4 : f32
    %16 = arith.mulf %15, %cst_13 : f32
    %17 = arith.mulf %11, %11 : vector<16x128xf32>
    %18 = vector.shape_cast %17 : vector<16x128xf32> to vector<1x16x128xf32>
    %cst_14 = arith.constant dense<0.000000e+00> : vector<1xf32>
    %19 = vector.multi_reduction <add>, %18, %cst_14 [1, 2] : vector<1x16x128xf32> to vector<1xf32>
    %20 = vector.shape_cast %19 : vector<1xf32> to vector<1x1x1xf32>
    %21 = vector.extract %20[0, 0, 0] : f32 from vector<1x1x1xf32>
    %cst_15 = arith.constant 4.8828125E-4 : f32
    %22 = arith.mulf %21, %cst_15 : f32
    %23 = arith.mulf %16, %16 : f32
    %24 = arith.subf %22, %23 : f32
    %cst_16 = arith.constant 0.000000e+00 : f32
    %25 = arith.maximumf %24, %cst_16 : f32
    %26 = vector.broadcast %16 : f32 to vector<16x128xf32>
    %27 = arith.subf %11, %26 : vector<16x128xf32>
    %cst_17 = arith.constant 9.99999974E-6 : f32
    %28 = arith.addf %25, %cst_17 : f32
    %29 = math.rsqrt %28 : f32
    %30 = vector.broadcast %29 : f32 to vector<16x128xf32>
    %31 = arith.mulf %27, %30 : vector<16x128xf32>
    %32 = arith.mulf %31, %9 : vector<16x128xf32>
    %33 = arith.addf %32, %10 : vector<16x128xf32>
    %cst_18 = arith.constant 0.000000e+00 : f32
    %34 = vector.broadcast %cst_18 : f32 to vector<16x128xf32>
    %35 = arith.maximumf %33, %34 : vector<16x128xf32>
    %36 = arith.truncf %35 : vector<16x128xf32> to vector<16x128xbf16>
    %c0_19 = arith.constant 0 : index
    %c0_20 = arith.constant 0 : index
    %37 = vector.load %arg7[%c0_19, %c0_20] : memref<64x128xbf16, #tpu.memory_space<vmem>>, vector<16x128xbf16>
    tpu.vector_store %arg7[%c0_19, %c0_20], %36 {strides = array<i32>} : memref<64x128xbf16, #tpu.memory_space<vmem>>, vector<16x128xbf16>,
    %38 = vector.extract_strided_slice %8 {offsets = [16, 0], sizes = [16, 128], strides = [1, 1]} : vector<64x128xf32> to vector<16x128xf32>
    %39 = vector.shape_cast %38 : vector<16x128xf32> to vector<1x16x128xf32>
    %cst_21 = arith.constant dense<0.000000e+00> : vector<1xf32>
    %40 = vector.multi_reduction <add>, %39, %cst_21 [1, 2] : vector<1x16x128xf32> to vector<1xf32>
    %41 = vector.shape_cast %40 : vector<1xf32> to vector<1x1x1xf32>
    %42 = vector.extract %41[0, 0, 0] : f32 from vector<1x1x1xf32>
    %cst_22 = arith.constant 4.8828125E-4 : f32
    %43 = arith.mulf %42, %cst_22 : f32
    %44 = arith.mulf %38, %38 : vector<16x128xf32>
    %45 = vector.shape_cast %44 : vector<16x128xf32> to vector<1x16x128xf32>
    %cst_23 = arith.constant dense<0.000000e+00> : vector<1xf32>
    %46 = vector.multi_reduction <add>, %45, %cst_23 [1, 2] : vector<1x16x128xf32> to vector<1xf32>
    %47 = vector.shape_cast %46 : vector<1xf32> to vector<1x1x1xf32>
    %48 = vector.extract %47[0, 0, 0] : f32 from vector<1x1x1xf32>
    %cst_24 = arith.constant 4.8828125E-4 : f32
    %49 = arith.mulf %48, %cst_24 : f32
    %50 = arith.mulf %43, %43 : f32
    %51 = arith.subf %49, %50 : f32
    %cst_25 = arith.constant 0.000000e+00 : f32
    %52 = arith.maximumf %51, %cst_25 : f32
    %53 = vector.broadcast %43 : f32 to vector<16x128xf32>
    %54 = arith.subf %38, %53 : vector<16x128xf32>
    %cst_26 = arith.constant 9.99999974E-6 : f32
    %55 = arith.addf %52, %cst_26 : f32
    %56 = math.rsqrt %55 : f32
    %57 = vector.broadcast %56 : f32 to vector<16x128xf32>
    %58 = arith.mulf %54, %57 : vector<16x128xf32>
    %59 = arith.mulf %58, %9 : vector<16x128xf32>
    %60 = arith.addf %59, %10 : vector<16x128xf32>
    %cst_27 = arith.constant 0.000000e+00 : f32
    %61 = vector.broadcast %cst_27 : f32 to vector<16x128xf32>
    %62 = arith.maximumf %60, %61 : vector<16x128xf32>
    %63 = arith.truncf %62 : vector<16x128xf32> to vector<16x128xbf16>
    %c16 = arith.constant 16 : index
    %c0_28 = arith.constant 0 : index
    %64 = vector.load %arg7[%c16, %c0_28] : memref<64x128xbf16, #tpu.memory_space<vmem>>, vector<16x128xbf16>
    tpu.vector_store %arg7[%c16, %c0_28], %63 {strides = array<i32>} : memref<64x128xbf16, #tpu.memory_space<vmem>>, vector<16x128xbf16>,
    %65 = vector.extract_strided_slice %8 {offsets = [32, 0], sizes = [16, 128], strides = [1, 1]} : vector<64x128xf32> to vector<16x128xf32>
    %66 = vector.shape_cast %65 : vector<16x128xf32> to vector<1x16x128xf32>
    %cst_29 = arith.constant dense<0.000000e+00> : vector<1xf32>
    %67 = vector.multi_reduction <add>, %66, %cst_29 [1, 2] : vector<1x16x128xf32> to vector<1xf32>
    %68 = vector.shape_cast %67 : vector<1xf32> to vector<1x1x1xf32>
    %69 = vector.extract %68[0, 0, 0] : f32 from vector<1x1x1xf32>
    %cst_30 = arith.constant 4.8828125E-4 : f32
    %70 = arith.mulf %69, %cst_30 : f32
    %71 = arith.mulf %65, %65 : vector<16x128xf32>
    %72 = vector.shape_cast %71 : vector<16x128xf32> to vector<1x16x128xf32>
    %cst_31 = arith.constant dense<0.000000e+00> : vector<1xf32>
    %73 = vector.multi_reduction <add>, %72, %cst_31 [1, 2] : vector<1x16x128xf32> to vector<1xf32>
    %74 = vector.shape_cast %73 : vector<1xf32> to vector<1x1x1xf32>
    %75 = vector.extract %74[0, 0, 0] : f32 from vector<1x1x1xf32>
    %cst_32 = arith.constant 4.8828125E-4 : f32
    %76 = arith.mulf %75, %cst_32 : f32
    %77 = arith.mulf %70, %70 : f32
    %78 = arith.subf %76, %77 : f32
    %cst_33 = arith.constant 0.000000e+00 : f32
    %79 = arith.maximumf %78, %cst_33 : f32
    %80 = vector.broadcast %70 : f32 to vector<16x128xf32>
    %81 = arith.subf %65, %80 : vector<16x128xf32>
    %cst_34 = arith.constant 9.99999974E-6 : f32
    %82 = arith.addf %79, %cst_34 : f32
    %83 = math.rsqrt %82 : f32
    %84 = vector.broadcast %83 : f32 to vector<16x128xf32>
    %85 = arith.mulf %81, %84 : vector<16x128xf32>
    %86 = arith.mulf %85, %9 : vector<16x128xf32>
    %87 = arith.addf %86, %10 : vector<16x128xf32>
    %cst_35 = arith.constant 0.000000e+00 : f32
    %88 = vector.broadcast %cst_35 : f32 to vector<16x128xf32>
    %89 = arith.maximumf %87, %88 : vector<16x128xf32>
    %90 = arith.truncf %89 : vector<16x128xf32> to vector<16x128xbf16>
    %c32 = arith.constant 32 : index
    %c0_36 = arith.constant 0 : index
    %91 = vector.load %arg7[%c32, %c0_36] : memref<64x128xbf16, #tpu.memory_space<vmem>>, vector<16x128xbf16>
    tpu.vector_store %arg7[%c32, %c0_36], %90 {strides = array<i32>} : memref<64x128xbf16, #tpu.memory_space<vmem>>, vector<16x128xbf16>,
    %92 = vector.extract_strided_slice %8 {offsets = [48, 0], sizes = [16, 128], strides = [1, 1]} : vector<64x128xf32> to vector<16x128xf32>
    %93 = vector.shape_cast %92 : vector<16x128xf32> to vector<1x16x128xf32>
    %cst_37 = arith.constant dense<0.000000e+00> : vector<1xf32>
    %94 = vector.multi_reduction <add>, %93, %cst_37 [1, 2] : vector<1x16x128xf32> to vector<1xf32>
    %95 = vector.shape_cast %94 : vector<1xf32> to vector<1x1x1xf32>
    %96 = vector.extract %95[0, 0, 0] : f32 from vector<1x1x1xf32>
    %cst_38 = arith.constant 4.8828125E-4 : f32
    %97 = arith.mulf %96, %cst_38 : f32
    %98 = arith.mulf %92, %92 : vector<16x128xf32>
    %99 = vector.shape_cast %98 : vector<16x128xf32> to vector<1x16x128xf32>
    %cst_39 = arith.constant dense<0.000000e+00> : vector<1xf32>
    %100 = vector.multi_reduction <add>, %99, %cst_39 [1, 2] : vector<1x16x128xf32> to vector<1xf32>
    %101 = vector.shape_cast %100 : vector<1xf32> to vector<1x1x1xf32>
    %102 = vector.extract %101[0, 0, 0] : f32 from vector<1x1x1xf32>
    %cst_40 = arith.constant 4.8828125E-4 : f32
    %103 = arith.mulf %102, %cst_40 : f32
    %104 = arith.mulf %97, %97 : f32
    %105 = arith.subf %103, %104 : f32
    %cst_41 = arith.constant 0.000000e+00 : f32
    %106 = arith.maximumf %105, %cst_41 : f32
    %107 = vector.broadcast %97 : f32 to vector<16x128xf32>
    %108 = arith.subf %92, %107 : vector<16x128xf32>
    %cst_42 = arith.constant 9.99999974E-6 : f32
    %109 = arith.addf %106, %cst_42 : f32
    %110 = math.rsqrt %109 : f32
    %111 = vector.broadcast %110 : f32 to vector<16x128xf32>
    %112 = arith.mulf %108, %111 : vector<16x128xf32>
    %113 = arith.mulf %112, %9 : vector<16x128xf32>
    %114 = arith.addf %113, %10 : vector<16x128xf32>
    %cst_43 = arith.constant 0.000000e+00 : f32
    %115 = vector.broadcast %cst_43 : f32 to vector<16x128xf32>
    %116 = arith.maximumf %114, %115 : vector<16x128xf32>
    %117 = arith.truncf %116 : vector<16x128xf32> to vector<16x128xbf16>
    %c48 = arith.constant 48 : index
    %c0_44 = arith.constant 0 : index
    %118 = vector.load %arg7[%c48, %c0_44] : memref<64x128xbf16, #tpu.memory_space<vmem>>, vector<16x128xbf16>
    tpu.vector_store %arg7[%c48, %c0_44], %117 {strides = array<i32>} : memref<64x128xbf16, #tpu.memory_space<vmem>>, vector<16x128xbf16>,
    return
  }
  func.func @transform_0(%arg0: i32) -> (i32, i32) {
    %c0_i32 = arith.constant 0 : i32
    %c0_i32_0 = arith.constant 0 : i32
    return %arg0, %c0_i32 : i32, i32
  }
  func.func @transform_1(%arg0: i32) -> (i32, i32) {
    %c0_i32 = arith.constant 0 : i32
    %c0_i32_0 = arith.constant 0 : i32
    %c0_i32_1 = arith.constant 0 : i32
    return %c0_i32, %c0_i32_0 : i32, i32
  }
  func.func @transform_2(%arg0: i32) -> (i32, i32) {
    %c0_i32 = arith.constant 0 : i32
    %c0_i32_0 = arith.constant 0 : i32
    %c0_i32_1 = arith.constant 0 : i32
    return %c0_i32, %c0_i32_0 : i32, i32
  }
  func.func @transform_3(%arg0: i32) -> (i32, i32) {
    %c0_i32 = arith.constant 0 : i32
    %c0_i32_0 = arith.constant 0 : i32
    %c0_i32_1 = arith.constant 0 : i32
    return %c0_i32, %c0_i32_0 : i32, i32
  }
  func.func @transform_4(%arg0: i32) -> (i32, i32) {
    %c0_i32 = arith.constant 0 : i32
    %c0_i32_0 = arith.constant 0 : i32
    %c0_i32_1 = arith.constant 0 : i32
    return %c0_i32, %c0_i32_0 : i32, i32
  }
  func.func @transform_5(%arg0: i32) -> (i32, i32) {
    %c0_i32 = arith.constant 0 : i32
    %c0_i32_0 = arith.constant 0 : i32
    %c0_i32_1 = arith.constant 0 : i32
    return %c0_i32, %c0_i32_0 : i32, i32
  }
  func.func @transform_6(%arg0: i32) -> (i32, i32) {
    %c0_i32 = arith.constant 0 : i32
    %c0_i32_0 = arith.constant 0 : i32
    return %arg0, %c0_i32 : i32, i32
  }
}

</mosaic_0001>

<bundles_post_ra>
// kernel: mbgcnet_forward.6
= control target key start
LH: loop header
LB: loop body
LE: loop exit
PB: predicated region body
PF: predicated region fallthrough
CT: control target
= control target key end

     0   :  { %s618_s1 = inlined_call_operand.vmem [shape: bf16[128,128], index: 1, kind: input, shape index: {}]   ;;  %s619_s0 = inlined_call_operand.vmem [shape: bf16[128,128], index: 0, kind: input, shape index: {}]   ;;  %s620_s2 = inlined_call_operand.vmem [shape: f32[1,128], index: 2, kind: input, shape index: {}]   ;;  %s621_s3 = inlined_call_operand.vmem [shape: bf16[128,128], index: 3, kind: output, shape index: {}]  }
   0x1   :  { %v507_v0 = vld [vmem:[%s618_s1] sm:$0xff]   ;;  %v508_v1 = vld [vmem:[%s618_s1 + $0x8] sm:$0xff]   ;;  %v509_v2 = vld [vmem:[%s618_s1 + $0x10] sm:$0xff]  }
   0x2   :  { %459 = vmatprep.subr.bf16.mxu0 %v507_v0  ;;  %491 = vmatprep.subr.bf16.mxu1 %v507_v0  ;;  %v510_v3 = vld [vmem:[%s618_s1 + $0x18] sm:$0xff]   ;;  %v515_v4 = vld [vmem:[%s619_s0] sm:$0xff]   ;;  %v512_v7 = vld [vmem:[%s618_s1 + $0x28] sm:$0xff]  }
   0x3   :  { %460 = vmatpush3.bf16.msra.mxu0 %v507_v0  ;;  %499 = vmatpush3.bf16.msra.mxu1 %v507_v0  ;;  %v516_v5 = vld [vmem:[%s619_s0 + $0x20] sm:$0xff]   ;;  %v513_v8 = vld [vmem:[%s618_s1 + $0x30] sm:$0xff]   ;;  %v514_v9 = vld [vmem:[%s618_s1 + $0x38] sm:$0xff]  }
   0x4   :  { %461 = vmatprep.subr.bf16.mxu0 %v508_v1  ;;  %492 = vmatprep.subr.bf16.mxu1 %v508_v1  ;;  %v511_v6 = vld [vmem:[%s618_s1 + $0x20] sm:$0xff]   ;;  %v517_v10 = vld [vmem:[%s619_s0 + $0x8] sm:$0xff]   ;;  %v519_v12 = vld [vmem:[%s619_s0 + $0x10] sm:$0xff]  }
   0x5   :  { %475 = vmatprep.mubr.bf16.mxu0 %v515_v4  ;;  %483 = vmatprep.mubr.bf16.mxu1 %v516_v5  ;;  %v518_v11 = vld [vmem:[%s619_s0 + $0x28] sm:$0xff]   ;;  %v520_v13 = vld [vmem:[%s619_s0 + $0x30] sm:$0xff]   ;;  %v521_v14 = vld [vmem:[%s619_s0 + $0x18] sm:$0xff]  }
   0x6   :  { %v522_v15 = vld [vmem:[%s619_s0 + $0x38] sm:$0xff]   ;;  %v347_v16 = vld [vmem:[%s620_s2] ss:$0 sm:$0xff] }
   0x7   :  { %462 = vmatpush3.bf16.msra.mxu0 %v508_v1  ;;  %500 = vmatpush3.bf16.msra.mxu1 %v508_v1 }
   0x8   :  { %463 = vmatprep.subr.bf16.mxu0 %v509_v2  ;;  %493 = vmatprep.subr.bf16.mxu1 %v509_v2 }
   0xb   :  { %464 = vmatpush3.bf16.msra.mxu0 %v509_v2  ;;  %501 = vmatpush3.bf16.msra.mxu1 %v509_v2 }
   0xc   :  { %465 = vmatprep.subr.bf16.mxu0 %v510_v3  ;;  %494 = vmatprep.subr.bf16.mxu1 %v510_v3 }
   0xf   :  { %466 = vmatpush3.bf16.msra.mxu0 %v510_v3  ;;  %502 = vmatpush3.bf16.msra.mxu1 %v510_v3 }
  0x10   :  { %467 = vmatprep.subr.bf16.mxu0 %v511_v6  ;;  %495 = vmatprep.subr.bf16.mxu1 %v511_v6 }
  0x13   :  { %468 = vmatpush3.bf16.msra.mxu0 %v511_v6  ;;  %503 = vmatpush3.bf16.msra.mxu1 %v511_v6 }
  0x14   :  { %469 = vmatprep.subr.bf16.mxu0 %v512_v7  ;;  %496 = vmatprep.subr.bf16.mxu1 %v512_v7 }
  0x17   :  { %470 = vmatpush3.bf16.msra.mxu0 %v512_v7  ;;  %504 = vmatpush3.bf16.msra.mxu1 %v512_v7 }
  0x18   :  { %471 = vmatprep.subr.bf16.mxu0 %v513_v8  ;;  %497 = vmatprep.subr.bf16.mxu1 %v513_v8 }
  0x1b   :  { %472 = vmatpush3.bf16.msra.mxu0 %v513_v8  ;;  %505 = vmatpush3.bf16.msra.mxu1 %v513_v8 }
  0x1c   :  { %473 = vmatprep.subr.bf16.mxu0 %v514_v9  ;;  %498 = vmatprep.subr.bf16.mxu1 %v514_v9 }
  0x1f   :  { %474 = vmatpush3.bf16.msra.mxu0 %v514_v9  ;;  %506 = vmatpush3.bf16.msra.mxu1 %v514_v9 }
  0x22   :  { %476 = vmatmul.mubr.bf16.vlgmr.msra.gmra.mrb[0].mxu0 %v517_v10  ;;  %484 = vmatmul.mubr.bf16.vlgmr.msra.gmra.mrb[0].mxu1 %v518_v11 }
  0x23   :  { %479 = vmatprep.mubr.bf16.mxu0 %v519_v12  ;;  %487 = vmatprep.mubr.bf16.mxu1 %v520_v13 }
  0x2a   :  { %480 = vmatmul.mubr.bf16.gmra.mrb[4].mxu0 %v521_v14  ;;  %488 = vmatmul.mubr.bf16.gmra.mrb[4].mxu1 %v522_v15 }
  0xf5   :  { %v477_v17 = vpop.f32.mrb[0].mxu0  ;;  %v485_v18 = vpop.f32.mrb[0].mxu1 }
  0xf6   :  { %v193_v19 = vadd.f32 %v477_v17, %v347_v16  ;;  %v225_v20 = vadd.f32 %v485_v18, %v347_v16  ;;  %v184_v21 = vpop.f32.mrb[1].mxu0  ;;  %v216_v22 = vpop.f32.mrb[1].mxu1 }
  0xf7   :  { %v185_v23 = vadd.f32 %v347_v16, %v184_v21  ;;  %v217_v24 = vadd.f32 %v347_v16, %v216_v22  ;;  %v478_v25 = vpop.f32.mrb[2].mxu0  ;;  %v486_v26 = vpop.f32.mrb[2].mxu1 }
  0xf8   :  { %v196_v27 = vadd.f32 %v478_v25, %v347_v16  ;;  %v228_v28 = vadd.f32 %v486_v26, %v347_v16  ;;  %v187_v29 = vpop.f32.mrb[3].mxu0  ;;  %v219_v30 = vpop.f32.mrb[3].mxu1  ;;  %v249_v33 = vmax.f32 %v193_v19, 0.0  ;;  %v257_v34 = vmax.f32 %v225_v20, 0.0 }
  0xf9   :  { %v188_v31 = vadd.f32 %v347_v16, %v187_v29  ;;  %v220_v32 = vadd.f32 %v347_v16, %v219_v30  ;;  %v247_v37 = vmax.f32 %v185_v23, 0.0  ;;  %v255_v38 = vmax.f32 %v217_v24, 0.0 }
  0xfa   :  { %v250_v35 = vmax.f32 %v196_v27, 0.0  ;;  %v258_v36 = vmax.f32 %v228_v28, 0.0 }
  0xfb   :  { %v248_v39 = vmax.f32 %v188_v31, 0.0  ;;  %v256_v40 = vmax.f32 %v220_v32, 0.0 }
  0xfc   :  { %v404_v41 = vpack.c.bf16 %v250_v35, %v249_v33  ;;  %v424_v42 = vpack.c.bf16 %v258_v36, %v257_v34 }
  0xfd   :  { %v399_v43 = vpack.c.bf16 %v248_v39, %v247_v37  ;;  %v419_v44 = vpack.c.bf16 %v256_v40, %v255_v38  ;;  %v481_v45 = vpop.f32.mrb[4].mxu0  ;;  %v489_v46 = vpop.f32.mrb[4].mxu1 }
  0xfe   :  { %436 = vst [vmem:[%s621_s3 + $0x8] sm:$0xff] %v404_v41   ;;  %440 = vst [vmem:[%s621_s3 + $0x28] sm:$0xff] %v424_v42   ;;  %v209_v47 = vadd.f32 %v481_v45, %v347_v16  ;;  %v241_v48 = vadd.f32 %v489_v46, %v347_v16  ;;  %v200_v49 = vpop.f32.mrb[5].mxu0  ;;  %v232_v50 = vpop.f32.mrb[5].mxu1 }
  0xff   :  { %400 = vst [vmem:[%s621_s3] sm:$0xff] %v399_v43   ;;  %439 = vst [vmem:[%s621_s3 + $0x20] sm:$0xff] %v419_v44   ;;  %v201_v51 = vadd.f32 %v347_v16, %v200_v49  ;;  %v233_v52 = vadd.f32 %v347_v16, %v232_v50  ;;  %v482_v53 = vpop.f32.mrb[6].mxu0  ;;  %v490_v54 = vpop.f32.mrb[6].mxu1 }
 0x100   :  { %v212_v55 = vadd.f32 %v482_v53, %v347_v16  ;;  %v244_v56 = vadd.f32 %v490_v54, %v347_v16  ;;  %v203_v57 = vpop.f32.mrb[7].mxu0  ;;  %v235_v58 = vpop.f32.mrb[7].mxu1  ;;  %v253_v61 = vmax.f32 %v209_v47, 0.0  ;;  %v261_v62 = vmax.f32 %v241_v48, 0.0 }
 0x101   :  { %v204_v59 = vadd.f32 %v347_v16, %v203_v57  ;;  %v236_v60 = vadd.f32 %v347_v16, %v235_v58  ;;  %v251_v1 = vmax.f32 %v201_v51, 0.0  ;;  %v259_v2 = vmax.f32 %v233_v52, 0.0 }
 0x102   :  { %v254_v63 = vmax.f32 %v212_v55, 0.0  ;;  %v262_v0 = vmax.f32 %v244_v56, 0.0 }
 0x103   :  { %v252_v3 = vmax.f32 %v204_v59, 0.0  ;;  %v260_v4 = vmax.f32 %v236_v60, 0.0 }
 0x104   :  { %v414_v5 = vpack.c.bf16 %v254_v63, %v253_v61  ;;  %v434_v6 = vpack.c.bf16 %v262_v0, %v261_v62 }
 0x105   :  { %v409_v7 = vpack.c.bf16 %v252_v3, %v251_v1  ;;  %v429_v8 = vpack.c.bf16 %v260_v4, %v259_v2 }
 0x106   :  { %438 = vst [vmem:[%s621_s3 + $0x18] sm:$0xff] %v414_v5   ;;  %442 = vst [vmem:[%s621_s3 + $0x38] sm:$0xff] %v434_v6  }
 0x107   :  { %437 = vst [vmem:[%s621_s3 + $0x10] sm:$0xff] %v409_v7   ;;  %441 = vst [vmem:[%s621_s3 + $0x30] sm:$0xff] %v429_v8  }

// kernel: mbgcnet_forward.7
= control target key start
LH: loop header
LB: loop body
LE: loop exit
PB: predicated region body
PF: predicated region fallthrough
CT: control target
= control target key end

     0   :  { %vm1651_vm0 = vmmov 0   ;;  %s2029_s1 = inlined_call_operand.vmem [shape: bf16[1664,128], index: 1, kind: input, shape index: {}]   ;;  %s2030_s0 = inlined_call_operand.vmem [shape: bf16[16,1664], index: 0, kind: input, shape index: {}]   ;;  %s2031_s2 = inlined_call_operand.vmem [shape: f32[1,128], index: 2, kind: input, shape index: {}]   ;;  %s2032_s3 = inlined_call_operand.vmem [shape: bf16[16,128], index: 3, kind: output, shape index: {}]  }
   0x1   :  { %v1527_v0 = vld [vmem:[%s2029_s1 + $0x40] sm:$0xff]   ;;  %v1531_v4 = vld [vmem:[%s2029_s1 + $0x48] sm:$0xff]   ;;  %v1535_v8 = vld [vmem:[%s2029_s1 + $0x50] sm:$0xff]  }
   0x2   :  { %v1528_v1 = vld [vmem:[%s2029_s1] sm:$0xff]   ;;  %1364 = vmatprep.subr.bf16.mxu0 %v1527_v0  ;;  %v1532_v5 = vld [vmem:[%s2029_s1 + $0x8] sm:$0xff]   ;;  %v1536_v9 = vld [vmem:[%s2029_s1 + $0x10] sm:$0xff]  }
   0x3   :  { %v1529_v2 = vld [vmem:[%s2029_s1 + $0xc0] sm:$0xff]   ;;  %1365 = vmatpush3.bf16.msra.mxu0 %v1528_v1  ;;  %v1533_v6 = vld [vmem:[%s2029_s1 + $0xc8] sm:$0xff]   ;;  %v1537_v10 = vld [vmem:[%s2029_s1 + $0xd0] sm:$0xff]  }
   0x4   :  { %v1530_v3 = vld [vmem:[%s2029_s1 + $0x80] sm:$0xff]   ;;  %1386 = vmatprep.subr.bf16.mxu1 %v1529_v2  ;;  %1366 = vmatprep.subr.bf16.mxu0 %v1531_v4  ;;  %v1534_v7 = vld [vmem:[%s2029_s1 + $0x88] sm:$0xff]   ;;  %v1538_v11 = vld [vmem:[%s2029_s1 + $0x90] sm:$0xff]  }
   0x5   :  { %1387 = vmatpush3.bf16.msra.mxu1 %v1530_v3  ;;  %v1539_v12 = vld [vmem:[%s2029_s1 + $0x58] sm:$0xff]   ;;  %v1543_v16 = vld [vmem:[%s2029_s1 + $0x60] sm:$0xff]   ;;  %v1547_v20 = vld [vmem:[%s2029_s1 + $0x68] sm:$0xff]  }
   0x6   :  { %1388 = vmatprep.subr.bf16.mxu1 %v1533_v6  ;;  %v1540_v13 = vld [vmem:[%s2029_s1 + $0x18] sm:$0xff]   ;;  %v1544_v17 = vld [vmem:[%s2029_s1 + $0x20] sm:$0xff]   ;;  %v1548_v21 = vld [vmem:[%s2029_s1 + $0x28] sm:$0xff]  }
   0x7   :  { %1367 = vmatpush3.bf16.msra.mxu0 %v1532_v5  ;;  %v1541_v14 = vld [vmem:[%s2029_s1 + $0xd8] sm:$0xff]   ;;  %v1545_v18 = vld [vmem:[%s2029_s1 + $0xe0] sm:$0xff]   ;;  %v1549_v22 = vld [vmem:[%s2029_s1 + $0xe8] sm:$0xff]  }
   0x8   :  { %1368 = vmatprep.subr.bf16.mxu0 %v1535_v8  ;;  %v1542_v15 = vld [vmem:[%s2029_s1 + $0x98] sm:$0xff]   ;;  %v1546_v19 = vld [vmem:[%s2029_s1 + $0xa0] sm:$0xff]   ;;  %v1550_v23 = vld [vmem:[%s2029_s1 + $0xa8] sm:$0xff]  }
   0x9   :  { %1389 = vmatpush3.bf16.msra.mxu1 %v1534_v7  ;;  %v1551_v24 = vld [vmem:[%s2029_s1 + $0x70] sm:$0xff]   ;;  %v1555_v28 = vld [vmem:[%s2029_s1 + $0x78] sm:$0xff]   ;;  %v1562_v34 = vld [vmem:[%s2029_s1 + $0x140] sm:$0xff]  }
   0xa   :  { %1390 = vmatprep.subr.bf16.mxu1 %v1537_v10  ;;  %v1552_v25 = vld [vmem:[%s2029_s1 + $0x30] sm:$0xff]   ;;  %v1556_v29 = vld [vmem:[%s2029_s1 + $0x38] sm:$0xff]   ;;  %v1565_v36 = vld [vmem:[%s2030_s0 + $0xc] ss:$52 sps:$4 sm:$0xff]  }
   0xb   :  { %1369 = vmatpush3.bf16.msra.mxu0 %v1536_v9  ;;  %v1553_v26 = vld [vmem:[%s2029_s1 + $0xf0] sm:$0xff]   ;;  %v1557_v30 = vld [vmem:[%s2029_s1 + $0xf8] sm:$0xff]   ;;  %v1566_v37 = vld [vmem:[%s2029_s1 + $0x100] sm:$0xff]   ;;  %1007 = vmatprep.mubr.bf16.mxu1 %v1565_v36 }
   0xc   :  { %1370 = vmatprep.subr.bf16.mxu0 %v1539_v12  ;;  %v1554_v27 = vld [vmem:[%s2029_s1 + $0xb0] sm:$0xff]   ;;  %v1560_v32 = vld [vmem:[%s2030_s0 + $0x4] ss:$52 sps:$4 sm:$0xff]   ;;  %v1563_v35 = vld [vmem:[%s2030_s0 + $0x8] ss:$52 sps:$4 sm:$0xff]  }
   0xd   :  { %1391 = vmatpush3.bf16.msra.mxu1 %v1538_v11  ;;  %v1558_v31 = vld [vmem:[%s2030_s0] ss:$52 sps:$4 sm:$0xff]   ;;  %v1561_v33 = vld [vmem:[%s2029_s1 + $0xb8] sm:$0xff]   ;;  %966 = vmatprep.mubr.bf16.mxu0 %v1560_v32  ;;  %v1569_v40 = vld [vmem:[%s2029_s1 + $0x148] sm:$0xff]  }
   0xe   :  { %1392 = vmatprep.subr.bf16.mxu1 %v1541_v14  ;;  %v1567_v38 = vld [vmem:[%s2029_s1 + $0x1c0] sm:$0xff]   ;;  %v1570_v41 = vld [vmem:[%s2029_s1 + $0x108] sm:$0xff]   ;;  %v1573_v44 = vld [vmem:[%s2029_s1 + $0x150] sm:$0xff]  }
   0xf   :  { %1371 = vmatpush3.bf16.msra.mxu0 %v1540_v13  ;;  %v1568_v39 = vld [vmem:[%s2029_s1 + $0x180] sm:$0xff]   ;;  %v1571_v42 = vld [vmem:[%s2029_s1 + $0x1c8] sm:$0xff]   ;;  %v1574_v45 = vld [vmem:[%s2029_s1 + $0x110] sm:$0xff]  }
  0x10   :  { %1372 = vmatprep.subr.bf16.mxu0 %v1543_v16  ;;  %v1572_v43 = vld [vmem:[%s2029_s1 + $0x188] sm:$0xff]   ;;  %v1575_v46 = vld [vmem:[%s2029_s1 + $0x1d0] sm:$0xff]   ;;  %v1577_v48 = vld [vmem:[%s2029_s1 + $0x158] sm:$0xff]  }
  0x11   :  { %1393 = vmatpush3.bf16.msra.mxu1 %v1542_v15  ;;  %v1576_v47 = vld [vmem:[%s2029_s1 + $0x190] sm:$0xff]   ;;  %v1578_v49 = vld [vmem:[%s2029_s1 + $0x118] sm:$0xff]   ;;  %v1581_v52 = vld [vmem:[%s2029_s1 + $0x160] sm:$0xff]  }
  0x12   :  { %1394 = vmatprep.subr.bf16.mxu1 %v1545_v18  ;;  %v1579_v50 = vld [vmem:[%s2029_s1 + $0x1d8] sm:$0xff]   ;;  %v1582_v53 = vld [vmem:[%s2029_s1 + $0x120] sm:$0xff]   ;;  %v1585_v56 = vld [vmem:[%s2029_s1 + $0x168] sm:$0xff]  }
  0x13   :  { %1373 = vmatpush3.bf16.msra.mxu0 %v1544_v17  ;;  %v1580_v51 = vld [vmem:[%s2029_s1 + $0x198] sm:$0xff]   ;;  %v1583_v54 = vld [vmem:[%s2029_s1 + $0x1e0] sm:$0xff]   ;;  %v1586_v57 = vld [vmem:[%s2029_s1 + $0x128] sm:$0xff]  }
  0x14   :  { %1374 = vmatprep.subr.bf16.mxu0 %v1547_v20  ;;  %v1584_v55 = vld [vmem:[%s2029_s1 + $0x1a0] sm:$0xff]   ;;  %v1587_v58 = vld [vmem:[%s2029_s1 + $0x1e8] sm:$0xff]   ;;  %v1589_v60 = vld [vmem:[%s2029_s1 + $0x170] sm:$0xff]  }
  0x15   :  { %1395 = vmatpush3.bf16.msra.mxu1 %v1546_v19  ;;  %v1588_v59 = vld [vmem:[%s2029_s1 + $0x1a8] sm:$0xff]   ;;  %v1590_v61 = vld [vmem:[%s2029_s1 + $0x130] sm:$0xff]   ;;  %v1593_v0 = vld [vmem:[%s2029_s1 + $0x178] sm:$0xff]  }
  0x16   :  { %1396 = vmatprep.subr.bf16.mxu1 %v1549_v22  ;;  %v1591_v62 = vld [vmem:[%s2029_s1 + $0x1f0] sm:$0xff]   ;;  %v1594_v1 = vld [vmem:[%s2029_s1 + $0x138] sm:$0xff]   ;;  %v1600_v6 = vld [vmem:[%s2029_s1 + $0x240] sm:$0xff]  }
  0x17   :  { %1375 = vmatpush3.bf16.msra.mxu0 %v1548_v21  ;;  %v1592_v63 = vld [vmem:[%s2029_s1 + $0x1b0] sm:$0xff]   ;;  %v1595_v2 = vld [vmem:[%s2029_s1 + $0x1f8] sm:$0xff]   ;;  %v1604_v9 = vld [vmem:[%s2029_s1 + $0x200] sm:$0xff]  }
  0x18   :  { %1376 = vmatprep.subr.bf16.mxu0 %v1551_v24  ;;  %v1596_v3 = vld [vmem:[%s2030_s0 + $0x10] ss:$52 sps:$4 sm:$0xff]   ;;  %v1598_v4 = vld [vmem:[%s2030_s0 + $0x14] ss:$52 sps:$4 sm:$0xff]   ;;  %v1599_v5 = vld [vmem:[%s2029_s1 + $0x1b8] sm:$0xff]  }
  0x19   :  { %1397 = vmatpush3.bf16.msra.mxu1 %v1550_v23  ;;  %v1601_v7 = vld [vmem:[%s2030_s0 + $0x18] ss:$52 sps:$4 sm:$0xff]   ;;  %v1603_v8 = vld [vmem:[%s2030_s0 + $0x1c] ss:$52 sps:$4 sm:$0xff]   ;;  %v1605_v10 = vld [vmem:[%s2029_s1 + $0x2c0] sm:$0xff]  }
  0x1a   :  { %1398 = vmatprep.subr.bf16.mxu1 %v1553_v26  ;;  %v1606_v11 = vld [vmem:[%s2029_s1 + $0x280] sm:$0xff]   ;;  %v1607_v12 = vld [vmem:[%s2029_s1 + $0x248] sm:$0xff]   ;;  %v1611_v16 = vld [vmem:[%s2029_s1 + $0x250] sm:$0xff]  }
  0x1b   :  { %1377 = vmatpush3.bf16.msra.mxu0 %v1552_v25  ;;  %v1608_v13 = vld [vmem:[%s2029_s1 + $0x208] sm:$0xff]   ;;  %v1612_v17 = vld [vmem:[%s2029_s1 + $0x210] sm:$0xff]   ;;  %v1615_v20 = vld [vmem:[%s2029_s1 + $0x258] sm:$0xff]  }
  0x1c   :  { %1378 = vmatprep.subr.bf16.mxu0 %v1555_v28  ;;  %v1609_v14 = vld [vmem:[%s2029_s1 + $0x2c8] sm:$0xff]   ;;  %v1613_v18 = vld [vmem:[%s2029_s1 + $0x2d0] sm:$0xff]   ;;  %v1616_v21 = vld [vmem:[%s2029_s1 + $0x218] sm:$0xff]  }
  0x1d   :  { %1399 = vmatpush3.bf16.msra.mxu1 %v1554_v27  ;;  %v1610_v15 = vld [vmem:[%s2029_s1 + $0x288] sm:$0xff]   ;;  %v1614_v19 = vld [vmem:[%s2029_s1 + $0x290] sm:$0xff]   ;;  %v1617_v22 = vld [vmem:[%s2029_s1 + $0x2d8] sm:$0xff]  }
  0x1e   :  { %1400 = vmatprep.subr.bf16.mxu1 %v1557_v30  ;;  %v1618_v23 = vld [vmem:[%s2029_s1 + $0x298] sm:$0xff]   ;;  %v1619_v24 = vld [vmem:[%s2029_s1 + $0x260] sm:$0xff]   ;;  %v1623_v28 = vld [vmem:[%s2029_s1 + $0x268] sm:$0xff]  }
  0x1f   :  { %1379 = vmatpush3.bf16.msra.mxu0 %v1556_v29  ;;  %v1620_v25 = vld [vmem:[%s2029_s1 + $0x220] sm:$0xff]   ;;  %v1624_v29 = vld [vmem:[%s2029_s1 + $0x228] sm:$0xff]   ;;  %v1627_v32 = vld [vmem:[%s2029_s1 + $0x270] sm:$0xff]  }
  0x20   :  { %1408 = vmatprep.subr.bf16.mxu0 %v1562_v34  ;;  %v1621_v26 = vld [vmem:[%s2029_s1 + $0x2e0] sm:$0xff]   ;;  %v1625_v30 = vld [vmem:[%s2029_s1 + $0x2e8] sm:$0xff]   ;;  %v1629_v34 = vld [vmem:[%s2029_s1 + $0x2f0] sm:$0xff]  }
  0x21   :  { %1401 = vmatpush3.bf16.msra.mxu1 %v1561_v33  ;;  %v1622_v27 = vld [vmem:[%s2029_s1 + $0x2a0] sm:$0xff]   ;;  %v1628_v33 = vld [vmem:[%s2029_s1 + $0x230] sm:$0xff]   ;;  %v1631_v36 = vld [vmem:[%s2029_s1 + $0x278] sm:$0xff]  }
  0x22   :  { %967 = vmatmul.mubr.bf16.vlgmr.msra.gmra.mrb[0].mxu0 %v1558_v31  ;;  %1430 = vmatprep.subr.bf16.mxu1 %v1567_v38  ;;  %v1626_v31 = vld [vmem:[%s2029_s1 + $0x2a8] sm:$0xff]   ;;  %v1633_v38 = vld [vmem:[%s2029_s1 + $0x2f8] sm:$0xff]  }
  0x23   :  { %1409 = vmatpush3.bf16.msra.mxu0 %v1566_v37  ;;  %1048 = vmatprep.mubr.bf16.mxu0 %v1598_v4  ;;  %v1632_v37 = vld [vmem:[%s2029_s1 + $0x238] sm:$0xff]  }
  0x24   :  { %1008 = vmatmul.mubr.bf16.vlgmr.msra.gmra.mrb[0].mxu1 %v1563_v35  ;;  %1410 = vmatprep.subr.bf16.mxu0 %v1569_v40  ;;  %v1630_v35 = vld [vmem:[%s2029_s1 + $0x2b0] sm:$0xff]   ;;  %v1636_v40 = vld [vmem:[%s2030_s0 + $0x24] ss:$52 sps:$4 sm:$0xff]  }
  0x25   :  { %1431 = vmatpush3.bf16.msra.mxu1 %v1568_v39  ;;  %1089 = vmatprep.mubr.bf16.mxu1 %v1603_v8  ;;  %v1634_v39 = vld [vmem:[%s2030_s0 + $0x20] ss:$52 sps:$4 sm:$0xff]  }
  0x26   :  { %1432 = vmatprep.subr.bf16.mxu1 %v1571_v42  ;;  %v1650_v42 = vmov 0.0  }
  0x27   :  { %1411 = vmatpush3.bf16.msra.mxu0 %v1570_v41  ;;  %v1637_v41 = vld [vmem:[%s2029_s1 + $0x2b8] sm:$0xff]  }
  0x28   :  { %1412 = vmatprep.subr.bf16.mxu0 %v1573_v44  ;;  %v1640_v44 = vld [vmem:[%s2030_s0 + $0x2c] ss:$52 sps:$4 sm:$0xff]  }
  0x29   :  { %1433 = vmatpush3.bf16.msra.mxu1 %v1572_v43  ;;  %v1638_v43 = vld [vmem:[%s2030_s0 + $0x28] ss:$52 sps:$4 sm:$0xff]  }
  0x2a   :  { %1434 = vmatprep.subr.bf16.mxu1 %v1575_v46  ;;  %v1642_v46 = vld [vmem:[%s2029_s1 + $0x308] sm:$0xff]  }
  0x2b   :  { %1413 = vmatpush3.bf16.msra.mxu0 %v1574_v45  ;;  %v1641_v45 = vld [vmem:[%s2029_s1 + $0x300] sm:$0xff]  }
  0x2c   :  { %1414 = vmatprep.subr.bf16.mxu0 %v1577_v48  ;;  %v1644_v48 = vld [vmem:[%s2029_s1 + $0x318] sm:$0xff]  }
  0x2d   :  { %1435 = vmatpush3.bf16.msra.mxu1 %v1576_v47  ;;  %v1643_v47 = vld [vmem:[%s2029_s1 + $0x310] sm:$0xff]  }
  0x2e   :  { %1436 = vmatprep.subr.bf16.mxu1 %v1579_v50  ;;  %v1646_v50 = vld [vmem:[%s2029_s1 + $0x328] sm:$0xff]  }
  0x2f   :  { %1415 = vmatpush3.bf16.msra.mxu0 %v1578_v49  ;;  %v1645_v49 = vld [vmem:[%s2029_s1 + $0x320] sm:$0xff]  }
  0x30   :  { %1416 = vmatprep.subr.bf16.mxu0 %v1581_v52  ;;  %v1648_v52 = vld [vmem:[%s2029_s1 + $0x338] sm:$0xff]  }
  0x31   :  { %1437 = vmatpush3.bf16.msra.mxu1 %v1580_v51  ;;  %v1647_v51 = vld [vmem:[%s2029_s1 + $0x330] sm:$0xff]  }
  0x32   :  { %1438 = vmatprep.subr.bf16.mxu1 %v1583_v54 }
  0x33   :  { %1417 = vmatpush3.bf16.msra.mxu0 %v1582_v53  ;;  %v1649_v53 = vld [vmem:[%s2030_s0 + $0x30] ss:$52 sps:$4 sm:$0xff]  }
  0x34   :  { %1418 = vmatprep.subr.bf16.mxu0 %v1585_v56 }
  0x35   :  { %1439 = vmatpush3.bf16.msra.mxu1 %v1584_v55  ;;  %v1237_v55 = vld [vmem:[%s2031_s2] ss:$0 sm:$0xff] }
  0x36   :  { %1440 = vmatprep.subr.bf16.mxu1 %v1587_v58 }
  0x37   :  { %1419 = vmatpush3.bf16.msra.mxu0 %v1586_v57 }
  0x38   :  { %1420 = vmatprep.subr.bf16.mxu0 %v1589_v60 }
  0x39   :  { %1441 = vmatpush3.bf16.msra.mxu1 %v1588_v59 }
  0x3a   :  { %1442 = vmatprep.subr.bf16.mxu1 %v1591_v62 }
  0x3b   :  { %1421 = vmatpush3.bf16.msra.mxu0 %v1590_v61 }
  0x3c   :  { %1422 = vmatprep.subr.bf16.mxu0 %v1593_v0 }
  0x3d   :  { %1443 = vmatpush3.bf16.msra.mxu1 %v1592_v63 }
  0x3e   :  { %1444 = vmatprep.subr.bf16.mxu1 %v1595_v2 }
  0x3f   :  { %1423 = vmatpush3.bf16.msra.mxu0 %v1594_v1 }
  0x40   :  { %1452 = vmatprep.subr.bf16.mxu0 %v1600_v6 }
  0x41   :  { %1445 = vmatpush3.bf16.msra.mxu1 %v1599_v5 }
  0x42   :  { %1049 = vmatmul.mubr.bf16.vlgmr.msra.gmra.mrb[4].mxu0 %v1596_v3  ;;  %1474 = vmatprep.subr.bf16.mxu1 %v1605_v10 }
  0x43   :  { %1453 = vmatpush3.bf16.msra.mxu0 %v1604_v9  ;;  %1130 = vmatprep.mubr.bf16.mxu0 %v1636_v40 }
  0x44   :  { %1090 = vmatmul.mubr.bf16.vlgmr.msra.gmra.mrb[4].mxu1 %v1601_v7  ;;  %1454 = vmatprep.subr.bf16.mxu0 %v1607_v12 }
  0x45   :  { %1475 = vmatpush3.bf16.msra.mxu1 %v1606_v11  ;;  %1171 = vmatprep.mubr.bf16.mxu1 %v1640_v44 }
  0x46   :  { %1476 = vmatprep.subr.bf16.mxu1 %v1609_v14 }
  0x47   :  { %1455 = vmatpush3.bf16.msra.mxu0 %v1608_v13 }
  0x48   :  { %1456 = vmatprep.subr.bf16.mxu0 %v1611_v16 }
  0x49   :  { %1477 = vmatpush3.bf16.msra.mxu1 %v1610_v15 }
  0x4a   :  { %1478 = vmatprep.subr.bf16.mxu1 %v1613_v18 }
  0x4b   :  { %1457 = vmatpush3.bf16.msra.mxu0 %v1612_v17 }
  0x4c   :  { %1458 = vmatprep.subr.bf16.mxu0 %v1615_v20 }
  0x4d   :  { %1479 = vmatpush3.bf16.msra.mxu1 %v1614_v19 }
  0x4e   :  { %1480 = vmatprep.subr.bf16.mxu1 %v1617_v22 }
  0x4f   :  { %1459 = vmatpush3.bf16.msra.mxu0 %v1616_v21 }
  0x50   :  { %1460 = vmatprep.subr.bf16.mxu0 %v1619_v24 }
  0x51   :  { %1481 = vmatpush3.bf16.msra.mxu1 %v1618_v23 }
  0x52   :  { %1482 = vmatprep.subr.bf16.mxu1 %v1621_v26 }
  0x53   :  { %1461 = vmatpush3.bf16.msra.mxu0 %v1620_v25 }
  0x54   :  { %1462 = vmatprep.subr.bf16.mxu0 %v1623_v28 }
  0x55   :  { %1483 = vmatpush3.bf16.msra.mxu1 %v1622_v27 }
  0x56   :  { %1484 = vmatprep.subr.bf16.mxu1 %v1625_v30 }
  0x57   :  { %1463 = vmatpush3.bf16.msra.mxu0 %v1624_v29 }
  0x58   :  { %1464 = vmatprep.subr.bf16.mxu0 %v1627_v32 }
  0x59   :  { %1485 = vmatpush3.bf16.msra.mxu1 %v1626_v31 }
  0x5a   :  { %1486 = vmatprep.subr.bf16.mxu1 %v1629_v34 }
  0x5b   :  { %1465 = vmatpush3.bf16.msra.mxu0 %v1628_v33 }
  0x5c   :  { %1466 = vmatprep.subr.bf16.mxu0 %v1631_v36 }
  0x5d   :  { %1487 = vmatpush3.bf16.msra.mxu1 %v1630_v35 }
  0x5e   :  { %1488 = vmatprep.subr.bf16.mxu1 %v1633_v38 }
  0x5f   :  { %1467 = vmatpush3.bf16.msra.mxu0 %v1632_v37 }
  0x60   :  { %1505 = vmatprep.subr.bf16.mxu0 %v1650_v42 }
  0x61   :  { %1489 = vmatpush3.bf16.msra.mxu1 %v1637_v41 }
  0x62   :  { %1131 = vmatmul.mubr.bf16.vlgmr.msra.gmra.mrb[8].mxu0 %v1634_v39 }
  0x63   :  { %1521 = vmatprep.mubr.msk.bf16.mxu0 %vm1651_vm0, %v1650_v42  ;;  %1506 = vmatpush3.bf16.msra.mxu0 %v1641_v45 }
  0x64   :  { %1172 = vmatmul.mubr.bf16.vlgmr.msra.gmra.mrb[8].mxu1 %v1638_v43  ;;  %1507 = vmatprep.subr.bf16.mxu0 %v1650_v42 }
  0x67   :  { %1508 = vmatpush3.bf16.msra.mxu0 %v1642_v46 }
  0x68   :  { %1509 = vmatprep.subr.bf16.mxu0 %v1650_v42 }
  0x6b   :  { %1510 = vmatpush3.bf16.msra.mxu0 %v1643_v47 }
  0x6c   :  { %1511 = vmatprep.subr.bf16.mxu0 %v1650_v42 }
  0x6f   :  { %1512 = vmatpush3.bf16.msra.mxu0 %v1644_v48 }
  0x70   :  { %1513 = vmatprep.subr.bf16.mxu0 %v1650_v42 }
  0x73   :  { %1514 = vmatpush3.bf16.msra.mxu0 %v1645_v49 }
  0x74   :  { %1515 = vmatprep.subr.bf16.mxu0 %v1650_v42 }
  0x77   :  { %1516 = vmatpush3.bf16.msra.mxu0 %v1646_v50 }
  0x78   :  { %1517 = vmatprep.subr.bf16.mxu0 %v1650_v42 }
  0x7b   :  { %1518 = vmatpush3.bf16.msra.mxu0 %v1647_v51 }
  0x7c   :  { %1519 = vmatprep.subr.bf16.mxu0 %v1650_v42 }
  0x7f   :  { %1520 = vmatpush3.bf16.msra.mxu0 %v1648_v52 }
  0x82   :  { %1522 = vmatmul.mubr.bf16.vlgmr.msra.gmra.mrb[12].mxu0 %v1649_v53 }
  0xf5   :  { %v1380_v54 = vpop.f32.mrb[0].mxu0 }
  0xf6   :  { %v1381_v56 = vpop.f32.mrb[1].mxu0 }
  0xf7   :  { %v1382_v57 = vadd.f32 %v1381_v56, %v1380_v54  ;;  %v1383_v58 = vpop.f32.mrb[2].mxu0  ;;  %v1402_v59 = vpop.f32.mrb[0].mxu1 }
  0xf8   :  { %v1384_v60 = vpop.f32.mrb[3].mxu0  ;;  %v1403_v63 = vpop.f32.mrb[1].mxu1 }
  0xf9   :  { %v969_v61 = vadd.f32 %v1382_v57, %v1237_v55  ;;  %v1385_v62 = vadd.f32 %v1384_v60, %v1383_v58  ;;  %v1404_v0 = vadd.f32 %v1403_v63, %v1402_v59  ;;  %v1405_v1 = vpop.f32.mrb[2].mxu1 }
  0xfa   :  { %v1406_v3 = vpop.f32.mrb[3].mxu1 }
  0xfb   :  { %v972_v2 = vadd.f32 %v1385_v62, %v1237_v55  ;;  %v1010_v4 = vadd.f32 %v1404_v0, %v969_v61  ;;  %v1407_v5 = vadd.f32 %v1406_v3, %v1405_v1 }
  0xfd   :  { %v1013_v6 = vadd.f32 %v1407_v5, %v972_v2 }
 0x115   :  { %v1424_v7 = vpop.f32.mrb[4].mxu0 }
 0x116   :  { %v1425_v8 = vpop.f32.mrb[5].mxu0 }
 0x117   :  { %v1426_v9 = vadd.f32 %v1425_v8, %v1424_v7  ;;  %v1427_v10 = vpop.f32.mrb[6].mxu0  ;;  %v1446_v13 = vpop.f32.mrb[4].mxu1 }
 0x118   :  { %v1428_v11 = vpop.f32.mrb[7].mxu0  ;;  %v1447_v15 = vpop.f32.mrb[5].mxu1 }
 0x119   :  { %v1051_v12 = vadd.f32 %v1426_v9, %v1010_v4  ;;  %v1429_v14 = vadd.f32 %v1428_v11, %v1427_v10  ;;  %v1448_v17 = vadd.f32 %v1447_v15, %v1446_v13  ;;  %v1449_v18 = vpop.f32.mrb[6].mxu1 }
 0x11a   :  { %v1450_v19 = vpop.f32.mrb[7].mxu1 }
 0x11b   :  { %v1054_v16 = vadd.f32 %v1429_v14, %v1013_v6  ;;  %v1092_v20 = vadd.f32 %v1448_v17, %v1051_v12  ;;  %v1451_v21 = vadd.f32 %v1450_v19, %v1449_v18 }
 0x11d   :  { %v1095_v22 = vadd.f32 %v1451_v21, %v1054_v16 }
 0x135   :  { %v1468_v23 = vpop.f32.mrb[8].mxu0 }
 0x136   :  { %v1469_v24 = vpop.f32.mrb[9].mxu0 }
 0x137   :  { %v1470_v25 = vadd.f32 %v1469_v24, %v1468_v23  ;;  %v1471_v26 = vpop.f32.mrb[10].mxu0  ;;  %v1490_v27 = vpop.f32.mrb[8].mxu1 }
 0x138   :  { %v1472_v28 = vpop.f32.mrb[11].mxu0  ;;  %v1491_v31 = vpop.f32.mrb[9].mxu1 }
 0x139   :  { %v1133_v29 = vadd.f32 %v1470_v25, %v1092_v20  ;;  %v1473_v30 = vadd.f32 %v1472_v28, %v1471_v26  ;;  %v1492_v32 = vadd.f32 %v1491_v31, %v1490_v27  ;;  %v1493_v33 = vpop.f32.mrb[10].mxu1 }
 0x13a   :  { %v1494_v35 = vpop.f32.mrb[11].mxu1 }
 0x13b   :  { %v1136_v34 = vadd.f32 %v1473_v30, %v1095_v22  ;;  %v1495_v36 = vadd.f32 %v1494_v35, %v1493_v33  ;;  %v1174_v37 = vadd.f32 %v1492_v32, %v1133_v29 }
 0x13d   :  { %v1177_v38 = vadd.f32 %v1495_v36, %v1136_v34 }
 0x155   :  { %v1214_v39 = vpop.f32.mrb[12].mxu0 }
 0x156   :  { %v1215_v40 = vadd.f32 %v1214_v39, %v1174_v37  ;;  %v1523_v41 = vpop.f32.mrb[13].mxu0 }
 0x157   :  { %v1217_v42 = vpop.f32.mrb[14].mxu0 }
 0x158   :  { %v1218_v43 = vadd.f32 %v1217_v42, %v1177_v38  ;;  %v1524_v44 = vpop.f32.mrb[15].mxu0  ;;  %v1221_v45 = vmax.f32 %v1215_v40, 0.0 }
 0x15a   :  { %v1222_v46 = vmax.f32 %v1218_v43, 0.0 }
 0x15c   :  { %v1362_v47 = vpack.c.bf16 %v1222_v46, %v1221_v45 }
 0x15e   :  { %1363 = vst [vmem:[%s2032_s3] sm:$0xff] %v1362_v47  }

// kernel: mbgcnet_forward.11
= control target key start
LH: loop header
LB: loop body
LE: loop exit
PB: predicated region body
PF: predicated region fallthrough
CT: control target
= control target key end

     0   :  { %v438_v1 = vmov 0.0   ;;  %vm439_vm0 = vmmov 0   ;;  %s569_s1 = inlined_call_operand.vmem [shape: bf16[256,128], index: 1, kind: input, shape index: {}]   ;;  %s570_s0 = inlined_call_operand.vmem [shape: bf16[16,256], index: 0, kind: input, shape index: {}]   ;;  %s571_s3 = inlined_call_operand.vmem [shape: bf16[128,128], index: 3, kind: input, shape index: {}]   ;;  %s572_s2 = inlined_call_operand.vmem [shape: f32[1,128], index: 2, kind: input, shape index: {}]   ;;  %s573_s4 = inlined_call_operand.vmem [shape: f32[1,128], index: 4, kind: input, shape index: {}]   ;;  %s574_s5 = inlined_call_operand.vmem [shape: f32[16,128], index: 5, kind: output, shape index: {}]  }
   0x1   :  { %v411_v0 = vld [vmem:[%s569_s1 + $0x40] sm:$0xff]   ;;  %389 = vmatprep.subr.bf16.mxu1 %v438_v1  ;;  %v413_v3 = vld [vmem:[%s569_s1 + $0x48] sm:$0xff]   ;;  %v415_v5 = vld [vmem:[%s569_s1 + $0x50] sm:$0xff]   ;;  %405 = vmatprep.mubr.msk.bf16.mxu1 %vm439_vm0, %v438_v1 }
   0x2   :  { %v412_v2 = vld [vmem:[%s569_s1] sm:$0xff]   ;;  %358 = vmatprep.subr.bf16.mxu0 %v411_v0  ;;  %v414_v4 = vld [vmem:[%s569_s1 + $0x8] sm:$0xff]   ;;  %v416_v6 = vld [vmem:[%s569_s1 + $0x10] sm:$0xff]  }
   0x3   :  { %359 = vmatpush3.bf16.msra.mxu0 %v412_v2  ;;  %v417_v7 = vld [vmem:[%s569_s1 + $0x58] sm:$0xff]   ;;  %v419_v9 = vld [vmem:[%s569_s1 + $0x60] sm:$0xff]   ;;  %v421_v11 = vld [vmem:[%s569_s1 + $0x68] sm:$0xff]  }
   0x4   :  { %360 = vmatprep.subr.bf16.mxu0 %v413_v3  ;;  %v418_v8 = vld [vmem:[%s569_s1 + $0x18] sm:$0xff]   ;;  %v420_v10 = vld [vmem:[%s569_s1 + $0x20] sm:$0xff]   ;;  %v422_v12 = vld [vmem:[%s569_s1 + $0x28] sm:$0xff]  }
   0x5   :  { %v429_v13 = vld [vmem:[%s570_s0 + $0x4] ss:$8 sps:$4 sm:$0xff]   ;;  %v423_v15 = vld [vmem:[%s569_s1 + $0x70] sm:$0xff]   ;;  %v425_v18 = vld [vmem:[%s569_s1 + $0x78] sm:$0xff]  }
   0x6   :  { %v430_v14 = vld [vmem:[%s571_s3] sm:$0xff]   ;;  %200 = vmatprep.mubr.bf16.mxu0 %v429_v13  ;;  %v431_v16 = vld [vmem:[%s571_s3 + $0x8] sm:$0xff]   ;;  %v424_v17 = vld [vmem:[%s569_s1 + $0x30] sm:$0xff]  }
   0x7   :  { %361 = vmatpush3.bf16.msra.mxu0 %v414_v4  ;;  %390 = vmatpush3.bf16.msra.mxu1 %v430_v14  ;;  %v432_v19 = vld [vmem:[%s571_s3 + $0x10] sm:$0xff]   ;;  %v426_v20 = vld [vmem:[%s569_s1 + $0x38] sm:$0xff]   ;;  %v427_v22 = vld [vmem:[%s570_s0] ss:$8 sps:$4 sm:$0xff]  }
   0x8   :  { %362 = vmatprep.subr.bf16.mxu0 %v415_v5  ;;  %391 = vmatprep.subr.bf16.mxu1 %v438_v1  ;;  %v433_v21 = vld [vmem:[%s571_s3 + $0x18] sm:$0xff]   ;;  %v434_v23 = vld [vmem:[%s571_s3 + $0x20] sm:$0xff]   ;;  %v435_v24 = vld [vmem:[%s571_s3 + $0x28] sm:$0xff]  }
   0x9   :  { %v436_v25 = vld [vmem:[%s571_s3 + $0x30] sm:$0xff]   ;;  %v437_v26 = vld [vmem:[%s571_s3 + $0x38] sm:$0xff]   ;;  %v330_v28 = vld [vmem:[%s572_s2] ss:$0 sm:$0xff] }
   0xa   :  { %v349_v39 = vld [vmem:[%s573_s4] ss:$0 sm:$0xff] }
   0xb   :  { %363 = vmatpush3.bf16.msra.mxu0 %v416_v6  ;;  %392 = vmatpush3.bf16.msra.mxu1 %v431_v16 }
   0xc   :  { %364 = vmatprep.subr.bf16.mxu0 %v417_v7  ;;  %393 = vmatprep.subr.bf16.mxu1 %v438_v1 }
   0xf   :  { %365 = vmatpush3.bf16.msra.mxu0 %v418_v8  ;;  %394 = vmatpush3.bf16.msra.mxu1 %v432_v19 }
  0x10   :  { %366 = vmatprep.subr.bf16.mxu0 %v419_v9  ;;  %395 = vmatprep.subr.bf16.mxu1 %v438_v1 }
  0x13   :  { %367 = vmatpush3.bf16.msra.mxu0 %v420_v10  ;;  %396 = vmatpush3.bf16.msra.mxu1 %v433_v21 }
  0x14   :  { %368 = vmatprep.subr.bf16.mxu0 %v421_v11  ;;  %397 = vmatprep.subr.bf16.mxu1 %v438_v1 }
  0x17   :  { %369 = vmatpush3.bf16.msra.mxu0 %v422_v12  ;;  %398 = vmatpush3.bf16.msra.mxu1 %v434_v23 }
  0x18   :  { %370 = vmatprep.subr.bf16.mxu0 %v423_v15  ;;  %399 = vmatprep.subr.bf16.mxu1 %v438_v1 }
  0x1b   :  { %371 = vmatpush3.bf16.msra.mxu0 %v424_v17  ;;  %400 = vmatpush3.bf16.msra.mxu1 %v435_v24 }
  0x1c   :  { %372 = vmatprep.subr.bf16.mxu0 %v425_v18  ;;  %401 = vmatprep.subr.bf16.mxu1 %v438_v1 }
  0x1f   :  { %373 = vmatpush3.bf16.msra.mxu0 %v426_v20  ;;  %402 = vmatpush3.bf16.msra.mxu1 %v436_v25 }
  0x20   :  { %403 = vmatprep.subr.bf16.mxu1 %v438_v1 }
  0x22   :  { %201 = vmatmul.mubr.bf16.vlgmr.msra.gmra.mrb[0].mxu0 %v427_v22 }
  0x23   :  { %404 = vmatpush3.bf16.msra.mxu1 %v437_v26 }
  0xf5   :  { %v374_v27 = vpop.f32.mrb[0].mxu0 }
  0xf6   :  { %v375_v29 = vpop.f32.mrb[1].mxu0 }
  0xf7   :  { %v376_v30 = vadd.f32 %v375_v29, %v374_v27  ;;  %v377_v31 = vpop.f32.mrb[2].mxu0 }
  0xf8   :  { %v378_v32 = vpop.f32.mrb[3].mxu0 }
  0xf9   :  { %v203_v33 = vadd.f32 %v376_v30, %v330_v28  ;;  %v379_v34 = vadd.f32 %v378_v32, %v377_v31 }
  0xfb   :  { %v206_v35 = vadd.f32 %v379_v34, %v330_v28  ;;  %v209_v36 = vmax.f32 %v203_v33, 0.0 }
  0xfd   :  { %v210_v37 = vmax.f32 %v206_v35, 0.0 }
  0xff   :  { %v211_v38 = vpack.c.bf16 %v210_v37, %v209_v36 }
 0x101   :  { %406 = vmatmul.mubr.bf16.vlgmr.msra.gmra.mrb[0].mxu1 %v211_v38 }
 0x1d4   :  { %v317_v40 = vpop.f32.mrb[0].mxu1 }
 0x1d5   :  { %v318_v41 = vadd.f32 %v349_v39, %v317_v40  ;;  %v407_v42 = vpop.f32.mrb[1].mxu1 }
 0x1d6   :  { %v320_v43 = vpop.f32.mrb[2].mxu1 }
 0x1d7   :  { %324 = vst [vmem:[%s574_s5] sm:$0xff] %v318_v41  ;;  %v321_v44 = vadd.f32 %v349_v39, %v320_v43  ;;  %v408_v45 = vpop.f32.mrb[3].mxu1 }
 0x1d9   :  { %325 = vst [vmem:[%s574_s5 + $0x8] sm:$0xff] %v321_v44 }

// kernel: mbgcnet_forward.9
= control target key start
LH: loop header
LB: loop body
LE: loop exit
PB: predicated region body
PF: predicated region fallthrough
CT: control target
= control target key end

     0   :  { %vm84_vm0 = vcmask 523264   ;;  %s691_s9 = smov 0.0   ;;  %s892_s1 = inlined_call_operand.vmem [shape: bf16[64,128], index: 1, kind: input, shape index: {}]   ;;  %s893_s0 = inlined_call_operand.vmem [shape: bf16[64,64], index: 0, kind: input, shape index: {}]   ;;  %s894_s2 = inlined_call_operand.vmem [shape: bf16[128,128], index: 2, kind: input, shape index: {}]   ;;  %s895_s3 = inlined_call_operand.vmem [shape: f32[1,128], index: 3, kind: input, shape index: {}]   ;;  %s896_s4 = inlined_call_operand.vmem [shape: f32[16,128], index: 4, kind: input, shape index: {}]   ;;  %s897_s5 = inlined_call_operand.vmem [shape: f32[16,128], index: 5, kind: input, shape index: {}]   ;;  %s898_s6 = inlined_call_operand.vmem [shape: bf16[64,128], index: 6, kind: output, shape index: {}]  }
   0x1   :  { %v667_v0 = vld [vmem:[%s892_s1] sm:$0xff]   ;;  %v668_v1 = vld [vmem:[%s892_s1 + $0x8] sm:$0xff]   ;;  %v669_v2 = vld [vmem:[%s892_s1 + $0x10] sm:$0xff]  }
   0x2   :  { %602 = vmatprep.subr.bf16.mxu0 %v667_v0  ;;  %v671_v3 = vld [vmem:[%s893_s0] sm:$0xff]   ;;  %v670_v4 = vld [vmem:[%s892_s1 + $0x18] sm:$0xff]   ;;  %v676_v6 = vld [vmem:[%s894_s2 + $0x8] sm:$0xff]  }
   0x3   :  { %603 = vmatpush3.bf16.msra.mxu0 %v667_v0  ;;  %610 = vmatprep.mubr.msk.bf16.mxu0 %vm84_vm0, %v671_v3  ;;  %v675_v5 = vld [vmem:[%s894_s2] sm:$0xff]   ;;  %v677_v7 = vld [vmem:[%s894_s2 + $0x10] sm:$0xff]   ;;  %v672_v8 = vld [vmem:[%s893_s0 + $0x8] sm:$0xff]  }
   0x4   :  { %604 = vmatprep.subr.bf16.mxu0 %v668_v1  ;;  %618 = vmatprep.subr.bf16.mxu1 %v675_v5  ;;  %v673_v9 = vld [vmem:[%s893_s0 + $0x10] sm:$0xff]   ;;  %v678_v10 = vld [vmem:[%s894_s2 + $0x18] sm:$0xff]   ;;  %v679_v11 = vld [vmem:[%s894_s2 + $0x20] sm:$0xff]  }
   0x5   :  { %619 = vmatpush3.bf16.msra.mxu1 %v675_v5  ;;  %v674_v12 = vld [vmem:[%s893_s0 + $0x18] sm:$0xff]   ;;  %v680_v13 = vld [vmem:[%s894_s2 + $0x28] sm:$0xff]   ;;  %v681_v14 = vld [vmem:[%s894_s2 + $0x30] sm:$0xff]  }
   0x6   :  { %620 = vmatprep.subr.bf16.mxu1 %v676_v6  ;;  %v682_v15 = vld [vmem:[%s894_s2 + $0x38] sm:$0xff]   ;;  %v534_v29 = vld [vmem:[%s895_s3] ss:$0 sm:$0xff] }
   0x7   :  { %605 = vmatpush3.bf16.msra.mxu0 %v668_v1 }
   0x8   :  { %606 = vmatprep.subr.bf16.mxu0 %v669_v2 }
   0x9   :  { %621 = vmatpush3.bf16.msra.mxu1 %v676_v6 }
   0xa   :  { %622 = vmatprep.subr.bf16.mxu1 %v677_v7 }
   0xb   :  { %607 = vmatpush3.bf16.msra.mxu0 %v669_v2 }
   0xc   :  { %608 = vmatprep.subr.bf16.mxu0 %v670_v4 }
   0xd   :  { %623 = vmatpush3.bf16.msra.mxu1 %v677_v7 }
   0xe   :  { %624 = vmatprep.subr.bf16.mxu1 %v678_v10 }
   0xf   :  { %609 = vmatpush3.bf16.msra.mxu0 %v670_v4 }
  0x11   :  { %625 = vmatpush3.bf16.msra.mxu1 %v678_v10 }
  0x12   :  { %611 = vmatmul.mubr.msk.bf16.vlgmr.msra.gmra.mrb[0].mxu0 %vm84_vm0, %v672_v8  ;;  %626 = vmatprep.subr.bf16.mxu1 %v679_v11 }
  0x13   :  { %614 = vmatprep.mubr.msk.bf16.mxu0 %vm84_vm0, %v673_v9 }
  0x15   :  { %627 = vmatpush3.bf16.msra.mxu1 %v679_v11 }
  0x16   :  { %628 = vmatprep.subr.bf16.mxu1 %v680_v13 }
  0x19   :  { %629 = vmatpush3.bf16.msra.mxu1 %v680_v13 }
  0x1a   :  { %615 = vmatmul.mubr.msk.bf16.gmra.mrb[4].mxu0 %vm84_vm0, %v674_v12  ;;  %630 = vmatprep.subr.bf16.mxu1 %v681_v14 }
  0x1d   :  { %631 = vmatpush3.bf16.msra.mxu1 %v681_v14 }
  0x1e   :  { %632 = vmatprep.subr.bf16.mxu1 %v682_v15 }
  0x21   :  { %633 = vmatpush3.bf16.msra.mxu1 %v682_v15 }
  0xe5   :  { %v612_v16 = vpop.f32.mrb[0].mxu0 }
  0xe6   :  { %v131_v17 = vpop.f32.mrb[1].mxu0 }
  0xe7   :  { %v613_v18 = vpop.f32.mrb[2].mxu0 }
  0xe8   :  { %v163_v19 = vpack.c.bf16 %v613_v18, %v612_v16  ;;  %v134_v20 = vpop.f32.mrb[3].mxu0 }
  0xe9   :  { %v162_v21 = vpack.c.bf16 %v134_v20, %v131_v17 }
  0xeb   :  { %634 = vmatprep.mubr.bf16.mxu1 %v162_v21 }
  0xec   :  { %635 = vmatmul.mubr.bf16.vlgmr.msra.gmra.mrb[0].mxu1 %v163_v19 }
  0xed   :  { %v616_v22 = vpop.f32.mrb[4].mxu0 }
  0xee   :  { %v147_v23 = vpop.f32.mrb[5].mxu0 }
  0xef   :  { %v617_v24 = vpop.f32.mrb[6].mxu0 }
  0xf0   :  { %v165_v25 = vpack.c.bf16 %v617_v24, %v616_v22  ;;  %v150_v26 = vpop.f32.mrb[7].mxu0 }
  0xf1   :  { %v164_v27 = vpack.c.bf16 %v150_v26, %v147_v23 }
  0xf3   :  { %638 = vmatprep.mubr.bf16.mxu1 %v164_v27 }
  0xf4   :  { %639 = vmatmul.mubr.bf16.gmra.mrb[4].mxu1 %v165_v25 }
 0x1bf   :  { %v636_v28 = vpop.f32.mrb[0].mxu1 }
 0x1c0   :  { %v271_v30 = vpop.f32.mrb[1].mxu1  ;;  %v782_v32 = vadd.f32 %v636_v28, %v534_v29 }
 0x1c1   :  { %v637_v31 = vpop.f32.mrb[2].mxu1  ;;  %v786_v35 = vadd.f32 %v534_v29, %v271_v30 }
 0x1c2   :  { %v784_v33 = vadd.f32 %v637_v31, %v534_v29  ;;  %v274_v34 = vpop.f32.mrb[3].mxu1  ;;  %v370_v41 = vmul.f32 %v782_v32, %v782_v32  ;;  %v828_v31 = vld [vmem:[%s896_s4] sm:$0xff] }
 0x1c3   :  { %v788_v36 = vadd.f32 %v534_v29, %v274_v34  ;;  %v317_v42 = vmul.f32 %v786_v35, %v786_v35  ;;  %v833_v34 = vld [vmem:[%s896_s4 + $0x8] sm:$0xff] }
 0x1c4   :  { %v359_v37 = vadd.f32 %v784_v33, %v782_v32  ;;  %v371_v38 = vmul.f32 %v784_v33, %v784_v33 }
 0x1c5   :  { %v306_v39 = vadd.f32 %v788_v36, %v786_v35  ;;  %v318_v40 = vmul.f32 %v788_v36, %v788_v36 }
 0x1c6   :  { %360 = vadd.xlane.f32.xlu1 %v359_v37  ;;  %v372_v44 = vadd.f32 %v371_v38, %v370_v41  ;;  %v840_v41 = vld [vmem:[%s897_s5] sm:$0xff] }
 0x1c7   :  { %307 = vadd.xlane.f32.xlu0 %v306_v39  ;;  %v640_v43 = vpop.f32.mrb[4].mxu1  ;;  %v319_v46 = vadd.f32 %v318_v40, %v317_v42  ;;  %v845_v42 = vld [vmem:[%s897_s5 + $0x8] sm:$0xff] }
 0x1c8   :  { %v287_v45 = vpop.f32.mrb[5].mxu1  ;;  %v802_v47 = vadd.f32 %v640_v43, %v534_v29 }
 0x1c9   :  { %v804_v48 = vadd.f32 %v534_v29, %v287_v45  ;;  %v641_v49 = vpop.f32.mrb[6].mxu1 }
 0x1ca   :  { %373 = vadd.xlane.f32.xlu1 %v372_v44  ;;  %v806_v50 = vadd.f32 %v641_v49, %v534_v29  ;;  %v290_v51 = vpop.f32.mrb[7].mxu1  ;;  %v476_v56 = vmul.f32 %v802_v47, %v802_v47 }
 0x1cb   :  { %320 = vadd.xlane.f32.xlu0 %v319_v46  ;;  %v808_v52 = vadd.f32 %v534_v29, %v290_v51  ;;  %v423_v53 = vmul.f32 %v804_v48, %v804_v48 }
 0x1cc   :  { %v477_v57 = vmul.f32 %v806_v50, %v806_v50  ;;  %v465_v59 = vadd.f32 %v806_v50, %v802_v47 }
 0x1cd   :  { %v412_v54 = vadd.f32 %v808_v52, %v804_v48  ;;  %v424_v55 = vmul.f32 %v808_v52, %v808_v52 }
 0x1ce   :  { %v478_v60 = vadd.f32 %v477_v57, %v476_v56 }
 0x1cf   :  { %413 = vadd.xlane.f32.xlu0 %v412_v54  ;;  %v425_v58 = vadd.f32 %v424_v55, %v423_v53 }
 0x1d1   :  { %426 = vadd.xlane.f32.xlu1 %v425_v58 }
 0x1d3   :  { %466 = vadd.xlane.f32.xlu0 %v465_v59 }
 0x1d5   :  { %479 = vadd.xlane.f32.xlu1 %v478_v60 }
 0x253   :  { %v361_v11 = vpop.xlane.xlu1 %360 }
 0x254   :  { %v308_v61 = vpop.xlane.xlu0 %307  ;;  %v362_v13 = vrot.slane %v361_v11, 4 }
 0x255   :  { %v309_v62 = vrot.slane %v308_v61, 4 }
 0x256   :  { %v363_v15 = vadd.f32 %v362_v13, %v361_v11 }
 0x257   :  { %v310_v63 = vadd.f32 %v309_v62, %v308_v61  ;;  %v374_v12 = vpop.xlane.xlu1 %373 }
 0x258   :  { %v321_v0 = vpop.xlane.xlu0 %320  ;;  %v375_v14 = vrot.slane %v374_v12, 4  ;;  %v364_v17 = vrot.slane %v363_v15, 2 }
 0x259   :  { %v311_v1 = vrot.slane %v310_v63, 2  ;;  %v322_v2 = vrot.slane %v321_v0, 4 }
 0x25a   :  { %v376_v16 = vadd.f32 %v375_v14, %v374_v12  ;;  %v365_v20 = vadd.f32 %v364_v17, %v363_v15 }
 0x25b   :  { %v323_v3 = vadd.f32 %v322_v2, %v321_v0  ;;  %v312_v4 = vadd.f32 %v311_v1, %v310_v63 }
 0x25c   :  { %v377_v18 = vrot.slane %v376_v16, 2  ;;  %v366_v22 = vrot.slane %v365_v20, 1  ;;  %v414_v30 = vpop.xlane.xlu0 %413 }
 0x25d   :  { %v324_v5 = vrot.slane %v323_v3, 2  ;;  %v313_v6 = vrot.slane %v312_v4, 1  ;;  %v415_v38 = vrot.slane %v414_v30, 4 }
 0x25e   :  { %v378_v21 = vadd.f32 %v377_v18, %v376_v16  ;;  %v367_v25 = vadd.f32 %v366_v22, %v365_v20  ;;  %v427_v39 = vpop.xlane.xlu1 %426 }
 0x25f   :  { %v314_v7 = vadd.f32 %v313_v6, %v312_v4  ;;  %v325_v8 = vadd.f32 %v324_v5, %v323_v3  ;;  %v416_v45 = vadd.f32 %v415_v38, %v414_v30 }
 0x260   :  { %v379_v23 = vrot.slane %v378_v21, 1  ;;  %v467_v3 = vpop.xlane.xlu0 %466 }
 0x261   :  { %642 = vpush %v314_v7  ;;  %v326_v9 = vrot.slane %v325_v8, 1  ;;  %v417_v55 = vrot.slane %v416_v45, 2 }
 0x262   :  { %v380_v26 = vadd.f32 %v379_v23, %v378_v21  ;;  %v480_v4 = vpop.xlane.xlu1 %479 }
 0x263   :  { %v327_v10 = vadd.f32 %v326_v9, %v325_v8  ;;  %v418_v59 = vadd.f32 %v417_v55, %v416_v45  ;;  %v468_v8 = vrot.slane %v467_v3, 4  ;;  %v481_v11 = vrot.slane %v480_v4, 4 }
 0x265   :  { %644 = vpush %v327_v10  ;;  %v419_v61 = vrot.slane %v418_v59, 1  ;;  %v482_v15 = vadd.f32 %v481_v11, %v480_v4 }
 0x267   :  { %v420_v0 = vadd.f32 %v419_v61, %v418_v59  ;;  %v483_v20 = vrot.slane %v482_v15, 2 }
 0x269   :  { %v484_v23 = vadd.f32 %v483_v20, %v482_v15 }
 0x292   :  { %s643_s3 = spop %642 }
 0x293   :  { %s316_s28 = smul.f32 0.00048828125, %s643_s3 }
 0x295   :  { %s330_s29 = smul.f32 %s316_s28, %s316_s28  ;;  %v333_v27 = vstv %s316_s28 }
 0x296   :  { %s645_s30 = spop %644  ;;  %v334_v28 = vsub.f32 %v786_v35, %v333_v27  ;;  %v335_v29 = vsub.f32 %v788_v36, %v333_v27  ;;  %v428_v36 = vrot.slane %v427_v39, 4 }
 0x297   :  { %s329_s7 = smul.f32 0.00048828125, %s645_s30 }
 0x298   :  { %v429_v51 = vadd.f32 %v428_v36, %v427_v39 }
 0x299   :  { %s331_s8 = ssub.f32 %s329_s7, %s330_s29 }
 0x29a   :  { %v430_v57 = vrot.slane %v429_v51, 2 }
 0x29b   :  { %s332_s10 = smax.f32 %s691_s9, %s331_s8 }
 0x29c   :  { %s336_s11 = sadd.f32 1e-05, %s332_s10  ;;  %v431_v60 = vadd.f32 %v430_v57, %v429_v51 }
 0x29e   :  { %v337_v19 = vstv %s336_s11  ;;  %v432_v62 = vrot.slane %v431_v60, 1 }
 0x29f   :  { %683 = vrsqrt.f32 %v337_v19 }
 0x2a0   :  { %v433_v1 = vadd.f32 %v432_v62, %v431_v60 }
 0x2a9   :  { %v684_v24 = vpop.eup %683 }
 0x2aa   :  { %646 = vpush %v684_v24 }
 0x2ab   :  { %648 = vpush %v367_v25  ;;  %v485_v25 = vrot.slane %v484_v23, 1 }
 0x2ac   :  { %650 = vpush %v380_v26 }
 0x2db   :  { %s647_s12 = spop %646 }
 0x2dc   :  { %v340_v37 = vstv %s647_s12  ;;  %s649_s16 = spop %648 }
 0x2dd   :  { %v341_v40 = vmul.f32 %v340_v37, %v334_v28  ;;  %v342_v35 = vmul.f32 %v340_v37, %v335_v29  ;;  %s835_s17 = smul.f32 0.00048828125, %s649_s16  ;;  %s651_s18 = spop %650  ;;  %v486_v28 = vadd.f32 %v485_v25, %v484_v23 }
 0x2de   :  { %s382_s4 = smul.f32 0.00048828125, %s651_s18 }
 0x2df   :  { %v343_v43 = vmul.f32 %v341_v40, %v828_v31  ;;  %v344_v44 = vmul.f32 %v342_v35, %v833_v34  ;;  %s383_s23 = smul.f32 %s835_s17, %s835_s17  ;;  %v386_v2 = vstv %s835_s17 }
 0x2e0   :  { %v387_v5 = vsub.f32 %v782_v32, %v386_v2  ;;  %v388_v6 = vsub.f32 %v784_v33, %v386_v2  ;;  %v469_v32 = vadd.f32 %v468_v8, %v467_v3 }
 0x2e1   :  { %v345_v46 = vadd.f32 %v343_v43, %v840_v41  ;;  %v346_v49 = vadd.f32 %v344_v44, %v845_v42  ;;  %s384_s24 = ssub.f32 %s382_s4, %s383_s23 }
 0x2e2   :  { %v470_v18 = vrot.slane %v469_v32, 2 }
 0x2e3   :  { %v347_v53 = vmax.f32 %v345_v46, 0.0  ;;  %v348_v54 = vmax.f32 %v346_v49, 0.0  ;;  %s385_s25 = smax.f32 %s691_s9, %s384_s24 }
 0x2e4   :  { %s389_s5 = sadd.f32 1e-05, %s385_s25  ;;  %v471_v22 = vadd.f32 %v470_v18, %v469_v32 }
 0x2e5   :  { %v562_v56 = vpack.c.bf16 %v348_v54, %v347_v53 }
 0x2e6   :  { %v390_v58 = vstv %s389_s5  ;;  %v472_v24 = vrot.slane %v471_v22, 1 }
 0x2e7   :  { %563 = vst [vmem:[%s898_s6] sm:$0xff] %v562_v56   ;;  %685 = vrsqrt.f32 %v390_v58 }
 0x2e8   :  { %v473_v27 = vadd.f32 %v472_v24, %v471_v22 }
 0x2f1   :  { %v686_v63 = vpop.eup %685 }
 0x2f2   :  { %652 = vpush %v686_v63 }
 0x2f3   :  { %654 = vpush %v420_v0 }
 0x2f4   :  { %656 = vpush %v433_v1 }
 0x323   :  { %s653_s0 = spop %652 }
 0x324   :  { %v393_v7 = vstv %s653_s0  ;;  %s655_s2 = spop %654 }
 0x325   :  { %v394_v9 = vmul.f32 %v393_v7, %v387_v5  ;;  %v395_v10 = vmul.f32 %v393_v7, %v388_v6  ;;  %s860_s3 = smul.f32 0.00048828125, %s655_s2  ;;  %s657_s28 = spop %656 }
 0x326   :  { %s435_s29 = smul.f32 0.00048828125, %s657_s28 }
 0x327   :  { %v396_v12 = vmul.f32 %v394_v9, %v828_v31  ;;  %v397_v13 = vmul.f32 %v395_v10, %v833_v34  ;;  %s436_s30 = smul.f32 %s860_s3, %s860_s3  ;;  %v439_v29 = vstv %s860_s3 }
 0x328   :  { %v440_v30 = vsub.f32 %v804_v48, %v439_v29  ;;  %v441_v37 = vsub.f32 %v808_v52, %v439_v29 }
 0x329   :  { %v398_v33 = vadd.f32 %v396_v12, %v840_v41  ;;  %v399_v14 = vadd.f32 %v397_v13, %v845_v42  ;;  %s437_s7 = ssub.f32 %s435_s29, %s436_s30 }
 0x32b   :  { %v400_v16 = vmax.f32 %v398_v33, 0.0  ;;  %v401_v17 = vmax.f32 %v399_v14, 0.0  ;;  %s438_s8 = smax.f32 %s691_s9, %s437_s7 }
 0x32c   :  { %s442_s10 = sadd.f32 1e-05, %s438_s8 }
 0x32d   :  { %v567_v19 = vpack.c.bf16 %v401_v17, %v400_v16 }
 0x32e   :  { %v443_v21 = vstv %s442_s10 }
 0x32f   :  { %579 = vst [vmem:[%s898_s6 + $0x8] sm:$0xff] %v567_v19   ;;  %687 = vrsqrt.f32 %v443_v21 }
 0x339   :  { %v688_v26 = vpop.eup %687 }
 0x33a   :  { %658 = vpush %v688_v26 }
 0x33b   :  { %660 = vpush %v473_v27 }
 0x33c   :  { %662 = vpush %v486_v28 }
 0x36b   :  { %s659_s13 = spop %658 }
 0x36c   :  { %v446_v38 = vstv %s659_s13  ;;  %s661_s1 = spop %660 }
 0x36d   :  { %v447_v39 = vmul.f32 %v446_v38, %v440_v30  ;;  %v448_v40 = vmul.f32 %v446_v38, %v441_v37  ;;  %s475_s14 = smul.f32 0.00048828125, %s661_s1  ;;  %s663_s15 = spop %662 }
 0x36e   :  { %s488_s16 = smul.f32 0.00048828125, %s663_s15 }
 0x36f   :  { %v449_v35 = vmul.f32 %v447_v39, %v828_v31  ;;  %v450_v36 = vmul.f32 %v448_v40, %v833_v34  ;;  %s489_s17 = smul.f32 %s475_s14, %s475_s14  ;;  %v492_v51 = vstv %s475_s14 }
 0x370   :  { %v493_v53 = vsub.f32 %v802_v47, %v492_v51  ;;  %v494_v54 = vsub.f32 %v806_v50, %v492_v51 }
 0x371   :  { %v451_v43 = vadd.f32 %v449_v35, %v840_v41  ;;  %v452_v44 = vadd.f32 %v450_v36, %v845_v42  ;;  %s490_s18 = ssub.f32 %s488_s16, %s489_s17 }
 0x373   :  { %v453_v48 = vmax.f32 %v451_v43, 0.0  ;;  %v454_v52 = vmax.f32 %v452_v44, 0.0  ;;  %s491_s19 = smax.f32 %s691_s9, %s490_s18 }
 0x374   :  { %s495_s20 = sadd.f32 1e-05, %s491_s19 }
 0x375   :  { %v572_v45 = vpack.c.bf16 %v454_v52, %v453_v48 }
 0x376   :  { %v496_v46 = vstv %s495_s20 }
 0x377   :  { %580 = vst [vmem:[%s898_s6 + $0x10] sm:$0xff] %v572_v45   ;;  %689 = vrsqrt.f32 %v496_v46 }
 0x381   :  { %v690_v49 = vpop.eup %689 }
 0x382   :  { %664 = vpush %v690_v49 }
 0x3b3   :  { %s665_s4 = spop %664 }
 0x3b4   :  { %v499_v55 = vstv %s665_s4 }
 0x3b5   :  { %v500_v56 = vmul.f32 %v499_v55, %v493_v53  ;;  %v501_v57 = vmul.f32 %v499_v55, %v494_v54 }
 0x3b7   :  { %v502_v58 = vmul.f32 %v500_v56, %v828_v31  ;;  %v503_v59 = vmul.f32 %v501_v57, %v833_v34 }
 0x3b9   :  { %v504_v60 = vadd.f32 %v502_v58, %v840_v41  ;;  %v505_v61 = vadd.f32 %v503_v59, %v845_v42 }
 0x3bb   :  { %v506_v62 = vmax.f32 %v504_v60, 0.0  ;;  %v507_v63 = vmax.f32 %v505_v61, 0.0 }
 0x3bd   :  { %v577_v0 = vpack.c.bf16 %v507_v63, %v506_v62 }
 0x3bf   :  { %581 = vst [vmem:[%s898_s6 + $0x18] sm:$0xff] %v577_v0  }

</bundles_post_ra>
